<compile_context>
chip_gen: v5e
topology: v5e:2x2
jax: 0.10.0
libtpu: 0.0.40
codegen_flags: <defaults>
</compile_context>

<pallas_src>
import functools

import jax
import jax.numpy as jnp
from jax.experimental import pallas as pl
from jax.experimental.pallas import tpu as pltpu

C_IN = 3
C_OUT = 4
KSIZE = 3
PAD = 1
STRIDE = 77
BN_EPS = 1e-5


def _fused_conv_bn_kernel(x_ref, w_ref, b_ref, g_ref, beta_ref, o_ref, *,
                          l_in, l_out):
    """x_ref: (C_IN, L, N) VMEM.  w_ref: (C_OUT*C_IN*K,) SMEM.
    b_ref/g_ref/beta_ref: (C_OUT,) SMEM.  o_ref: (C_OUT, L_out, N) VMEM."""
    n = x_ref.shape[2]
    inv_r = 1.0 / float(l_out * n)

    for co in range(C_OUT):
        # --- Conv1d as VPU broadcast-FMAs (lane-dense over N) -------------
        rows = []
        for t in range(l_out):
            acc = jnp.full((1, n), b_ref[co], dtype=jnp.float32)
            for c in range(C_IN):
                for k in range(KSIZE):
                    idx = t * STRIDE + k - PAD
                    if 0 <= idx < l_in:  # static zero-padding skip
                        w = w_ref[co * (C_IN * KSIZE) + c * KSIZE + k]
                        acc = acc + w * x_ref[c, idx:idx + 1, :]
            rows.append(acc)
        y = jnp.concatenate(rows, axis=0)                  # (L_out, N)

        # --- BatchNorm1d (train-mode batch stats), single pass, folded ----
        s1 = jnp.sum(y, axis=(0, 1), keepdims=True)        # (1, 1)
        s2 = jnp.sum(y * y, axis=(0, 1), keepdims=True)    # (1, 1)
        mean = s1 * inv_r
        var = s2 * inv_r - mean * mean                     # biased batch var
        a = g_ref[co] * jax.lax.rsqrt(var + BN_EPS)
        shift = beta_ref[co] - mean * a

        # --- (x+3).clamp(0,6) - 3, then *3/9 == *(1/3) ---------------------
        v = jnp.clip(y * a + shift + 3.0, 0.0, 6.0)
        o_ref[co, :, :] = (v - 3.0) * (1.0 / 3.0)


def model_forward(x, conv_w, conv_b, bn_gamma, bn_beta):
    """x: (N, C_IN, L) float32 -> (N, C_OUT, L_out) float32."""
    n, c_in, l_in = x.shape
    assert c_in == C_IN
    l_out = (l_in + 2 * PAD - KSIZE) // STRIDE + 1

    # Only wrapper glue: put the batch dim on the lane axis.  (C_IN, L, N)
    x_t = jnp.transpose(x.astype(jnp.float32), (1, 2, 0))
    w_flat = conv_w.astype(jnp.float32).reshape(-1)        # (C_OUT*C_IN*K,)

    kernel = functools.partial(_fused_conv_bn_kernel, l_in=l_in, l_out=l_out)
    out = pl.pallas_call(
        kernel,
        out_shape=jax.ShapeDtypeStruct((C_OUT, l_out, n), jnp.float32),
        in_specs=[
            pl.BlockSpec(memory_space=pltpu.MemorySpace.VMEM),   # x (C_IN, L, N)
            pl.BlockSpec(memory_space=pltpu.MemorySpace.SMEM),   # conv weights
            pl.BlockSpec(memory_space=pltpu.MemorySpace.SMEM),   # conv bias
            pl.BlockSpec(memory_space=pltpu.MemorySpace.SMEM),   # bn gamma
            pl.BlockSpec(memory_space=pltpu.MemorySpace.SMEM),   # bn beta
        ],
        out_specs=pl.BlockSpec(memory_space=pltpu.MemorySpace.VMEM),
    )(x_t, w_flat,
      conv_b.astype(jnp.float32),
      bn_gamma.astype(jnp.float32),
      bn_beta.astype(jnp.float32))

    # (C_OUT, L_out, N) -> (N, C_OUT, L_out)
    return jnp.transpose(out, (2, 0, 1))


def _reference(x, conv_w, conv_b, bn_gamma, bn_beta):
    """Pure-JAX reference of the PyTorch forward (train-mode BN)."""
    l_in = x.shape[2]
    l_out = (l_in + 2 * PAD - KSIZE) // STRIDE + 1
    xp = jnp.pad(x, ((0, 0), (0, 0), (PAD, PAD)))
    patches = jnp.stack(
        [xp[:, :, t * STRIDE: t * STRIDE + KSIZE] for t in range(l_out)],
        axis=1)                                            # (N, L_out, C_IN, K)
    y = jnp.einsum("nlck,ock->nol", patches, conv_w) + conv_b[None, :, None]
    mean = y.mean(axis=(0, 2), keepdims=True)
    var = ((y - mean) ** 2).mean(axis=(0, 2), keepdims=True)
    y2 = (y - mean) * jax.lax.rsqrt(var + BN_EPS) * bn_gamma[None, :, None] \
         + bn_beta[None, :, None]
    v = jnp.clip(y2 + 3.0, 0.0, 6.0)
    return (v - 3.0) * 3.0 / 9.0


if __name__ == "__main__":
    key = jax.random.PRNGKey(0)
    k_x, k_w, k_b = jax.random.split(key, 3)

    # Shapes from the spec: x1 = torch.randn(128, 3, 123); stride=77 -> L_out=2.
    # N=128 also makes the kernel's lane axis exactly one full vreg row.
    N, L = 128, 123
    x = jax.random.normal(k_x, (N, C_IN, L), dtype=jnp.float32)

    # Deterministic parameter init (PyTorch-style uniform bound for conv).
    fan_in = C_IN * KSIZE
    bound = 1.0 / (fan_in ** 0.5)
    conv_w = jax.random.uniform(k_w, (C_OUT, C_IN, KSIZE),
                                minval=-bound, maxval=bound, dtype=jnp.float32)
    conv_b = jax.random.uniform(k_b, (C_OUT,),
                                minval=-bound, maxval=bound, dtype=jnp.float32)
    bn_gamma = jnp.ones((C_OUT,), jnp.float32)
    bn_beta = jnp.zeros((C_OUT,), jnp.float32)

    y = model_forward(x, conv_w, conv_b, bn_gamma, bn_beta)
    jax.block_until_ready(y)
    assert y.shape == (N, C_OUT, 2), y.shape

    y_ref = _reference(x, conv_w, conv_b, bn_gamma, bn_beta)
    max_err = float(jnp.max(jnp.abs(y - y_ref)))
    assert max_err < 1e-3, max_err

    print("KERNEL_OK")
</pallas_src>

<mosaic_0001>
module attributes {stable_mosaic.version = 11 : i64} {
  func.func @_fused_conv_bn_kernel(%arg0: memref<3x123x128xf32, #tpu.memory_space<vmem>>, %arg1: memref<36xf32, #tpu.memory_space<smem>>, %arg2: memref<4xf32, #tpu.memory_space<smem>>, %arg3: memref<4xf32, #tpu.memory_space<smem>>, %arg4: memref<4xf32, #tpu.memory_space<smem>>, %arg5: memref<4x2x128xf32, #tpu.memory_space<vmem>>) attributes {dimension_semantics = [], scalar_prefetch = 0 : i64, scratch_operands = 0 : i64, tpu.core_type = #tpu.core_type<tc>} {
    %c0 = arith.constant 0 : index
    %0 = memref.load %arg2[%c0] : memref<4xf32, #tpu.memory_space<smem>>
    %1 = vector.broadcast %0 : f32 to vector<1x128xf32>
    %c1 = arith.constant 1 : index
    %2 = memref.load %arg1[%c1] : memref<36xf32, #tpu.memory_space<smem>>
    %c0_0 = arith.constant 0 : index
    %c0_1 = arith.constant 0 : index
    %c0_2 = arith.constant 0 : index
    %3 = vector.load %arg0[%c0_0, %c0_1, %c0_2] : memref<3x123x128xf32, #tpu.memory_space<vmem>>, vector<1x1x128xf32>
    %4 = vector.shape_cast %3 : vector<1x1x128xf32> to vector<1x128xf32>
    %5 = vector.broadcast %2 : f32 to vector<1x128xf32>
    %6 = arith.mulf %5, %4 : vector<1x128xf32>
    %7 = arith.addf %1, %6 : vector<1x128xf32>
    %c2 = arith.constant 2 : index
    %8 = memref.load %arg1[%c2] : memref<36xf32, #tpu.memory_space<smem>>
    %c0_3 = arith.constant 0 : index
    %c1_4 = arith.constant 1 : index
    %c0_5 = arith.constant 0 : index
    %9 = vector.load %arg0[%c0_3, %c1_4, %c0_5] : memref<3x123x128xf32, #tpu.memory_space<vmem>>, vector<1x1x128xf32>
    %10 = vector.shape_cast %9 : vector<1x1x128xf32> to vector<1x128xf32>
    %11 = vector.broadcast %8 : f32 to vector<1x128xf32>
    %12 = arith.mulf %11, %10 : vector<1x128xf32>
    %13 = arith.addf %7, %12 : vector<1x128xf32>
    %c4 = arith.constant 4 : index
    %14 = memref.load %arg1[%c4] : memref<36xf32, #tpu.memory_space<smem>>
    %c1_6 = arith.constant 1 : index
    %c0_7 = arith.constant 0 : index
    %c0_8 = arith.constant 0 : index
    %15 = vector.load %arg0[%c1_6, %c0_7, %c0_8] : memref<3x123x128xf32, #tpu.memory_space<vmem>>, vector<1x1x128xf32>
    %16 = vector.shape_cast %15 : vector<1x1x128xf32> to vector<1x128xf32>
    %17 = vector.broadcast %14 : f32 to vector<1x128xf32>
    %18 = arith.mulf %17, %16 : vector<1x128xf32>
    %19 = arith.addf %13, %18 : vector<1x128xf32>
    %c5 = arith.constant 5 : index
    %20 = memref.load %arg1[%c5] : memref<36xf32, #tpu.memory_space<smem>>
    %c1_9 = arith.constant 1 : index
    %c1_10 = arith.constant 1 : index
    %c0_11 = arith.constant 0 : index
    %21 = vector.load %arg0[%c1_9, %c1_10, %c0_11] : memref<3x123x128xf32, #tpu.memory_space<vmem>>, vector<1x1x128xf32>
    %22 = vector.shape_cast %21 : vector<1x1x128xf32> to vector<1x128xf32>
    %23 = vector.broadcast %20 : f32 to vector<1x128xf32>
    %24 = arith.mulf %23, %22 : vector<1x128xf32>
    %25 = arith.addf %19, %24 : vector<1x128xf32>
    %c7 = arith.constant 7 : index
    %26 = memref.load %arg1[%c7] : memref<36xf32, #tpu.memory_space<smem>>
    %c2_12 = arith.constant 2 : index
    %c0_13 = arith.constant 0 : index
    %c0_14 = arith.constant 0 : index
    %27 = vector.load %arg0[%c2_12, %c0_13, %c0_14] : memref<3x123x128xf32, #tpu.memory_space<vmem>>, vector<1x1x128xf32>
    %28 = vector.shape_cast %27 : vector<1x1x128xf32> to vector<1x128xf32>
    %29 = vector.broadcast %26 : f32 to vector<1x128xf32>
    %30 = arith.mulf %29, %28 : vector<1x128xf32>
    %31 = arith.addf %25, %30 : vector<1x128xf32>
    %c8 = arith.constant 8 : index
    %32 = memref.load %arg1[%c8] : memref<36xf32, #tpu.memory_space<smem>>
    %c2_15 = arith.constant 2 : index
    %c1_16 = arith.constant 1 : index
    %c0_17 = arith.constant 0 : index
    %33 = vector.load %arg0[%c2_15, %c1_16, %c0_17] : memref<3x123x128xf32, #tpu.memory_space<vmem>>, vector<1x1x128xf32>
    %34 = vector.shape_cast %33 : vector<1x1x128xf32> to vector<1x128xf32>
    %35 = vector.broadcast %32 : f32 to vector<1x128xf32>
    %36 = arith.mulf %35, %34 : vector<1x128xf32>
    %37 = arith.addf %31, %36 : vector<1x128xf32>
    %c0_18 = arith.constant 0 : index
    %38 = memref.load %arg2[%c0_18] : memref<4xf32, #tpu.memory_space<smem>>
    %39 = vector.broadcast %38 : f32 to vector<1x128xf32>
    %c0_19 = arith.constant 0 : index
    %40 = memref.load %arg1[%c0_19] : memref<36xf32, #tpu.memory_space<smem>>
    %c0_20 = arith.constant 0 : index
    %c76 = arith.constant 76 : index
    %c0_21 = arith.constant 0 : index
    %41 = vector.load %arg0[%c0_20, %c76, %c0_21] : memref<3x123x128xf32, #tpu.memory_space<vmem>>, vector<1x1x128xf32>
    %42 = vector.shape_cast %41 : vector<1x1x128xf32> to vector<1x128xf32>
    %43 = vector.broadcast %40 : f32 to vector<1x128xf32>
    %44 = arith.mulf %43, %42 : vector<1x128xf32>
    %45 = arith.addf %39, %44 : vector<1x128xf32>
    %c1_22 = arith.constant 1 : index
    %46 = memref.load %arg1[%c1_22] : memref<36xf32, #tpu.memory_space<smem>>
    %c0_23 = arith.constant 0 : index
    %c77 = arith.constant 77 : index
    %c0_24 = arith.constant 0 : index
    %47 = vector.load %arg0[%c0_23, %c77, %c0_24] : memref<3x123x128xf32, #tpu.memory_space<vmem>>, vector<1x1x128xf32>
    %48 = vector.shape_cast %47 : vector<1x1x128xf32> to vector<1x128xf32>
    %49 = vector.broadcast %46 : f32 to vector<1x128xf32>
    %50 = arith.mulf %49, %48 : vector<1x128xf32>
    %51 = arith.addf %45, %50 : vector<1x128xf32>
    %c2_25 = arith.constant 2 : index
    %52 = memref.load %arg1[%c2_25] : memref<36xf32, #tpu.memory_space<smem>>
    %c0_26 = arith.constant 0 : index
    %c78 = arith.constant 78 : index
    %c0_27 = arith.constant 0 : index
    %53 = vector.load %arg0[%c0_26, %c78, %c0_27] : memref<3x123x128xf32, #tpu.memory_space<vmem>>, vector<1x1x128xf32>
    %54 = vector.shape_cast %53 : vector<1x1x128xf32> to vector<1x128xf32>
    %55 = vector.broadcast %52 : f32 to vector<1x128xf32>
    %56 = arith.mulf %55, %54 : vector<1x128xf32>
    %57 = arith.addf %51, %56 : vector<1x128xf32>
    %c3 = arith.constant 3 : index
    %58 = memref.load %arg1[%c3] : memref<36xf32, #tpu.memory_space<smem>>
    %c1_28 = arith.constant 1 : index
    %c76_29 = arith.constant 76 : index
    %c0_30 = arith.constant 0 : index
    %59 = vector.load %arg0[%c1_28, %c76_29, %c0_30] : memref<3x123x128xf32, #tpu.memory_space<vmem>>, vector<1x1x128xf32>
    %60 = vector.shape_cast %59 : vector<1x1x128xf32> to vector<1x128xf32>
    %61 = vector.broadcast %58 : f32 to vector<1x128xf32>
    %62 = arith.mulf %61, %60 : vector<1x128xf32>
    %63 = arith.addf %57, %62 : vector<1x128xf32>
    %c4_31 = arith.constant 4 : index
    %64 = memref.load %arg1[%c4_31] : memref<36xf32, #tpu.memory_space<smem>>
    %c1_32 = arith.constant 1 : index
    %c77_33 = arith.constant 77 : index
    %c0_34 = arith.constant 0 : index
    %65 = vector.load %arg0[%c1_32, %c77_33, %c0_34] : memref<3x123x128xf32, #tpu.memory_space<vmem>>, vector<1x1x128xf32>
    %66 = vector.shape_cast %65 : vector<1x1x128xf32> to vector<1x128xf32>
    %67 = vector.broadcast %64 : f32 to vector<1x128xf32>
    %68 = arith.mulf %67, %66 : vector<1x128xf32>
    %69 = arith.addf %63, %68 : vector<1x128xf32>
    %c5_35 = arith.constant 5 : index
    %70 = memref.load %arg1[%c5_35] : memref<36xf32, #tpu.memory_space<smem>>
    %c1_36 = arith.constant 1 : index
    %c78_37 = arith.constant 78 : index
    %c0_38 = arith.constant 0 : index
    %71 = vector.load %arg0[%c1_36, %c78_37, %c0_38] : memref<3x123x128xf32, #tpu.memory_space<vmem>>, vector<1x1x128xf32>
    %72 = vector.shape_cast %71 : vector<1x1x128xf32> to vector<1x128xf32>
    %73 = vector.broadcast %70 : f32 to vector<1x128xf32>
    %74 = arith.mulf %73, %72 : vector<1x128xf32>
    %75 = arith.addf %69, %74 : vector<1x128xf32>
    %c6 = arith.constant 6 : index
    %76 = memref.load %arg1[%c6] : memref<36xf32, #tpu.memory_space<smem>>
    %c2_39 = arith.constant 2 : index
    %c76_40 = arith.constant 76 : index
    %c0_41 = arith.constant 0 : index
    %77 = vector.load %arg0[%c2_39, %c76_40, %c0_41] : memref<3x123x128xf32, #tpu.memory_space<vmem>>, vector<1x1x128xf32>
    %78 = vector.shape_cast %77 : vector<1x1x128xf32> to vector<1x128xf32>
    %79 = vector.broadcast %76 : f32 to vector<1x128xf32>
    %80 = arith.mulf %79, %78 : vector<1x128xf32>
    %81 = arith.addf %75, %80 : vector<1x128xf32>
    %c7_42 = arith.constant 7 : index
    %82 = memref.load %arg1[%c7_42] : memref<36xf32, #tpu.memory_space<smem>>
    %c2_43 = arith.constant 2 : index
    %c77_44 = arith.constant 77 : index
    %c0_45 = arith.constant 0 : index
    %83 = vector.load %arg0[%c2_43, %c77_44, %c0_45] : memref<3x123x128xf32, #tpu.memory_space<vmem>>, vector<1x1x128xf32>
    %84 = vector.shape_cast %83 : vector<1x1x128xf32> to vector<1x128xf32>
    %85 = vector.broadcast %82 : f32 to vector<1x128xf32>
    %86 = arith.mulf %85, %84 : vector<1x128xf32>
    %87 = arith.addf %81, %86 : vector<1x128xf32>
    %c8_46 = arith.constant 8 : index
    %88 = memref.load %arg1[%c8_46] : memref<36xf32, #tpu.memory_space<smem>>
    %c2_47 = arith.constant 2 : index
    %c78_48 = arith.constant 78 : index
    %c0_49 = arith.constant 0 : index
    %89 = vector.load %arg0[%c2_47, %c78_48, %c0_49] : memref<3x123x128xf32, #tpu.memory_space<vmem>>, vector<1x1x128xf32>
    %90 = vector.shape_cast %89 : vector<1x1x128xf32> to vector<1x128xf32>
    %91 = vector.broadcast %88 : f32 to vector<1x128xf32>
    %92 = arith.mulf %91, %90 : vector<1x128xf32>
    %93 = arith.addf %87, %92 : vector<1x128xf32>
    %94 = tpu.concatenate %37, %93 in 0 : vector<1x128xf32>, vector<1x128xf32> -> vector<2x128xf32>
    %95 = vector.shape_cast %94 : vector<2x128xf32> to vector<1x2x128xf32>
    %cst = arith.constant dense<0.000000e+00> : vector<1xf32>
    %96 = vector.multi_reduction <add>, %95, %cst [1, 2] : vector<1x2x128xf32> to vector<1xf32>
    %97 = vector.shape_cast %96 : vector<1xf32> to vector<1x1x1xf32>
    %98 = vector.extract %97[0, 0, 0] : f32 from vector<1x1x1xf32>
    %99 = vector.broadcast %98 : f32 to vector<1x1xf32>
    %100 = arith.mulf %94, %94 : vector<2x128xf32>
    %101 = vector.shape_cast %100 : vector<2x128xf32> to vector<1x2x128xf32>
    %cst_50 = arith.constant dense<0.000000e+00> : vector<1xf32>
    %102 = vector.multi_reduction <add>, %101, %cst_50 [1, 2] : vector<1x2x128xf32> to vector<1xf32>
    %103 = vector.shape_cast %102 : vector<1xf32> to vector<1x1x1xf32>
    %104 = vector.extract %103[0, 0, 0] : f32 from vector<1x1x1xf32>
    %105 = vector.broadcast %104 : f32 to vector<1x1xf32>
    %cst_51 = arith.constant 3.906250e-03 : f32
    %106 = vector.broadcast %cst_51 : f32 to vector<1x1xf32>
    %107 = arith.mulf %99, %106 : vector<1x1xf32>
    %cst_52 = arith.constant 3.906250e-03 : f32
    %108 = vector.broadcast %cst_52 : f32 to vector<1x1xf32>
    %109 = arith.mulf %105, %108 : vector<1x1xf32>
    %110 = arith.mulf %107, %107 : vector<1x1xf32>
    %111 = arith.subf %109, %110 : vector<1x1xf32>
    %c0_53 = arith.constant 0 : index
    %112 = memref.load %arg3[%c0_53] : memref<4xf32, #tpu.memory_space<smem>>
    %cst_54 = arith.constant 9.99999974E-6 : f32
    %113 = vector.broadcast %cst_54 : f32 to vector<1x1xf32>
    %114 = arith.addf %111, %113 : vector<1x1xf32>
    %115 = math.rsqrt %114 : vector<1x1xf32>
    %116 = vector.broadcast %112 : f32 to vector<1x1xf32>
    %117 = arith.mulf %116, %115 : vector<1x1xf32>
    %c0_55 = arith.constant 0 : index
    %118 = memref.load %arg4[%c0_55] : memref<4xf32, #tpu.memory_space<smem>>
    %119 = arith.mulf %107, %117 : vector<1x1xf32>
    %120 = vector.broadcast %118 : f32 to vector<1x1xf32>
    %121 = arith.subf %120, %119 : vector<1x1xf32>
    %122 = vector.broadcast %117 : vector<1x1xf32> to vector<2x128xf32>
    %123 = arith.mulf %94, %122 : vector<2x128xf32>
    %124 = vector.broadcast %121 : vector<1x1xf32> to vector<2x128xf32>
    %125 = arith.addf %123, %124 : vector<2x128xf32>
    %cst_56 = arith.constant 3.000000e+00 : f32
    %126 = vector.broadcast %cst_56 : f32 to vector<2x128xf32>
    %127 = arith.addf %125, %126 : vector<2x128xf32>
    %cst_57 = arith.constant 0.000000e+00 : f32
    %cst_58 = arith.constant 6.000000e+00 : f32
    %128 = vector.broadcast %cst_57 : f32 to vector<2x128xf32>
    %129 = arith.maximumf %128, %127 : vector<2x128xf32>
    %130 = vector.broadcast %cst_58 : f32 to vector<2x128xf32>
    %131 = arith.minimumf %130, %129 : vector<2x128xf32>
    %cst_59 = arith.constant 3.000000e+00 : f32
    %132 = vector.broadcast %cst_59 : f32 to vector<2x128xf32>
    %133 = arith.subf %131, %132 : vector<2x128xf32>
    %cst_60 = arith.constant 0.333333343 : f32
    %134 = vector.broadcast %cst_60 : f32 to vector<2x128xf32>
    %135 = arith.mulf %133, %134 : vector<2x128xf32>
    %c0_61 = arith.constant 0 : index
    %c0_62 = arith.constant 0 : index
    %c0_63 = arith.constant 0 : index
    %136 = vector.load %arg5[%c0_61, %c0_62, %c0_63] : memref<4x2x128xf32, #tpu.memory_space<vmem>>, vector<1x2x128xf32>
    %137 = vector.shape_cast %136 : vector<1x2x128xf32> to vector<2x128xf32>
    %138 = vector.shape_cast %135 : vector<2x128xf32> to vector<1x2x128xf32>
    tpu.vector_store %arg5[%c0_61, %c0_62, %c0_63], %138 {strides = array<i32>} : memref<4x2x128xf32, #tpu.memory_space<vmem>>, vector<1x2x128xf32>,
    %c1_64 = arith.constant 1 : index
    %139 = memref.load %arg2[%c1_64] : memref<4xf32, #tpu.memory_space<smem>>
    %140 = vector.broadcast %139 : f32 to vector<1x128xf32>
    %c10 = arith.constant 10 : index
    %141 = memref.load %arg1[%c10] : memref<36xf32, #tpu.memory_space<smem>>
    %c0_65 = arith.constant 0 : index
    %c0_66 = arith.constant 0 : index
    %c0_67 = arith.constant 0 : index
    %142 = vector.load %arg0[%c0_65, %c0_66, %c0_67] : memref<3x123x128xf32, #tpu.memory_space<vmem>>, vector<1x1x128xf32>
    %143 = vector.shape_cast %142 : vector<1x1x128xf32> to vector<1x128xf32>
    %144 = vector.broadcast %141 : f32 to vector<1x128xf32>
    %145 = arith.mulf %144, %143 : vector<1x128xf32>
    %146 = arith.addf %140, %145 : vector<1x128xf32>
    %c11 = arith.constant 11 : index
    %147 = memref.load %arg1[%c11] : memref<36xf32, #tpu.memory_space<smem>>
    %c0_68 = arith.constant 0 : index
    %c1_69 = arith.constant 1 : index
    %c0_70 = arith.constant 0 : index
    %148 = vector.load %arg0[%c0_68, %c1_69, %c0_70] : memref<3x123x128xf32, #tpu.memory_space<vmem>>, vector<1x1x128xf32>
    %149 = vector.shape_cast %148 : vector<1x1x128xf32> to vector<1x128xf32>
    %150 = vector.broadcast %147 : f32 to vector<1x128xf32>
    %151 = arith.mulf %150, %149 : vector<1x128xf32>
    %152 = arith.addf %146, %151 : vector<1x128xf32>
    %c13 = arith.constant 13 : index
    %153 = memref.load %arg1[%c13] : memref<36xf32, #tpu.memory_space<smem>>
    %c1_71 = arith.constant 1 : index
    %c0_72 = arith.constant 0 : index
    %c0_73 = arith.constant 0 : index
    %154 = vector.load %arg0[%c1_71, %c0_72, %c0_73] : memref<3x123x128xf32, #tpu.memory_space<vmem>>, vector<1x1x128xf32>
    %155 = vector.shape_cast %154 : vector<1x1x128xf32> to vector<1x128xf32>
    %156 = vector.broadcast %153 : f32 to vector<1x128xf32>
    %157 = arith.mulf %156, %155 : vector<1x128xf32>
    %158 = arith.addf %152, %157 : vector<1x128xf32>
    %c14 = arith.constant 14 : index
    %159 = memref.load %arg1[%c14] : memref<36xf32, #tpu.memory_space<smem>>
    %c1_74 = arith.constant 1 : index
    %c1_75 = arith.constant 1 : index
    %c0_76 = arith.constant 0 : index
    %160 = vector.load %arg0[%c1_74, %c1_75, %c0_76] : memref<3x123x128xf32, #tpu.memory_space<vmem>>, vector<1x1x128xf32>
    %161 = vector.shape_cast %160 : vector<1x1x128xf32> to vector<1x128xf32>
    %162 = vector.broadcast %159 : f32 to vector<1x128xf32>
    %163 = arith.mulf %162, %161 : vector<1x128xf32>
    %164 = arith.addf %158, %163 : vector<1x128xf32>
    %c16 = arith.constant 16 : index
    %165 = memref.load %arg1[%c16] : memref<36xf32, #tpu.memory_space<smem>>
    %c2_77 = arith.constant 2 : index
    %c0_78 = arith.constant 0 : index
    %c0_79 = arith.constant 0 : index
    %166 = vector.load %arg0[%c2_77, %c0_78, %c0_79] : memref<3x123x128xf32, #tpu.memory_space<vmem>>, vector<1x1x128xf32>
    %167 = vector.shape_cast %166 : vector<1x1x128xf32> to vector<1x128xf32>
    %168 = vector.broadcast %165 : f32 to vector<1x128xf32>
    %169 = arith.mulf %168, %167 : vector<1x128xf32>
    %170 = arith.addf %164, %169 : vector<1x128xf32>
    %c17 = arith.constant 17 : index
    %171 = memref.load %arg1[%c17] : memref<36xf32, #tpu.memory_space<smem>>
    %c2_80 = arith.constant 2 : index
    %c1_81 = arith.constant 1 : index
    %c0_82 = arith.constant 0 : index
    %172 = vector.load %arg0[%c2_80, %c1_81, %c0_82] : memref<3x123x128xf32, #tpu.memory_space<vmem>>, vector<1x1x128xf32>
    %173 = vector.shape_cast %172 : vector<1x1x128xf32> to vector<1x128xf32>
    %174 = vector.broadcast %171 : f32 to vector<1x128xf32>
    %175 = arith.mulf %174, %173 : vector<1x128xf32>
    %176 = arith.addf %170, %175 : vector<1x128xf32>
    %c1_83 = arith.constant 1 : index
    %177 = memref.load %arg2[%c1_83] : memref<4xf32, #tpu.memory_space<smem>>
    %178 = vector.broadcast %177 : f32 to vector<1x128xf32>
    %c9 = arith.constant 9 : index
    %179 = memref.load %arg1[%c9] : memref<36xf32, #tpu.memory_space<smem>>
    %c0_84 = arith.constant 0 : index
    %c76_85 = arith.constant 76 : index
    %c0_86 = arith.constant 0 : index
    %180 = vector.load %arg0[%c0_84, %c76_85, %c0_86] : memref<3x123x128xf32, #tpu.memory_space<vmem>>, vector<1x1x128xf32>
    %181 = vector.shape_cast %180 : vector<1x1x128xf32> to vector<1x128xf32>
    %182 = vector.broadcast %179 : f32 to vector<1x128xf32>
    %183 = arith.mulf %182, %181 : vector<1x128xf32>
    %184 = arith.addf %178, %183 : vector<1x128xf32>
    %c10_87 = arith.constant 10 : index
    %185 = memref.load %arg1[%c10_87] : memref<36xf32, #tpu.memory_space<smem>>
    %c0_88 = arith.constant 0 : index
    %c77_89 = arith.constant 77 : index
    %c0_90 = arith.constant 0 : index
    %186 = vector.load %arg0[%c0_88, %c77_89, %c0_90] : memref<3x123x128xf32, #tpu.memory_space<vmem>>, vector<1x1x128xf32>
    %187 = vector.shape_cast %186 : vector<1x1x128xf32> to vector<1x128xf32>
    %188 = vector.broadcast %185 : f32 to vector<1x128xf32>
    %189 = arith.mulf %188, %187 : vector<1x128xf32>
    %190 = arith.addf %184, %189 : vector<1x128xf32>
    %c11_91 = arith.constant 11 : index
    %191 = memref.load %arg1[%c11_91] : memref<36xf32, #tpu.memory_space<smem>>
    %c0_92 = arith.constant 0 : index
    %c78_93 = arith.constant 78 : index
    %c0_94 = arith.constant 0 : index
    %192 = vector.load %arg0[%c0_92, %c78_93, %c0_94] : memref<3x123x128xf32, #tpu.memory_space<vmem>>, vector<1x1x128xf32>
    %193 = vector.shape_cast %192 : vector<1x1x128xf32> to vector<1x128xf32>
    %194 = vector.broadcast %191 : f32 to vector<1x128xf32>
    %195 = arith.mulf %194, %193 : vector<1x128xf32>
    %196 = arith.addf %190, %195 : vector<1x128xf32>
    %c12 = arith.constant 12 : index
    %197 = memref.load %arg1[%c12] : memref<36xf32, #tpu.memory_space<smem>>
    %c1_95 = arith.constant 1 : index
    %c76_96 = arith.constant 76 : index
    %c0_97 = arith.constant 0 : index
    %198 = vector.load %arg0[%c1_95, %c76_96, %c0_97] : memref<3x123x128xf32, #tpu.memory_space<vmem>>, vector<1x1x128xf32>
    %199 = vector.shape_cast %198 : vector<1x1x128xf32> to vector<1x128xf32>
    %200 = vector.broadcast %197 : f32 to vector<1x128xf32>
    %201 = arith.mulf %200, %199 : vector<1x128xf32>
    %202 = arith.addf %196, %201 : vector<1x128xf32>
    %c13_98 = arith.constant 13 : index
    %203 = memref.load %arg1[%c13_98] : memref<36xf32, #tpu.memory_space<smem>>
    %c1_99 = arith.constant 1 : index
    %c77_100 = arith.constant 77 : index
    %c0_101 = arith.constant 0 : index
    %204 = vector.load %arg0[%c1_99, %c77_100, %c0_101] : memref<3x123x128xf32, #tpu.memory_space<vmem>>, vector<1x1x128xf32>
    %205 = vector.shape_cast %204 : vector<1x1x128xf32> to vector<1x128xf32>
    %206 = vector.broadcast %203 : f32 to vector<1x128xf32>
    %207 = arith.mulf %206, %205 : vector<1x128xf32>
    %208 = arith.addf %202, %207 : vector<1x128xf32>
    %c14_102 = arith.constant 14 : index
    %209 = memref.load %arg1[%c14_102] : memref<36xf32, #tpu.memory_space<smem>>
    %c1_103 = arith.constant 1 : index
    %c78_104 = arith.constant 78 : index
    %c0_105 = arith.constant 0 : index
    %210 = vector.load %arg0[%c1_103, %c78_104, %c0_105] : memref<3x123x128xf32, #tpu.memory_space<vmem>>, vector<1x1x128xf32>
    %211 = vector.shape_cast %210 : vector<1x1x128xf32> to vector<1x128xf32>
    %212 = vector.broadcast %209 : f32 to vector<1x128xf32>
    %213 = arith.mulf %212, %211 : vector<1x128xf32>
    %214 = arith.addf %208, %213 : vector<1x128xf32>
    %c15 = arith.constant 15 : index
    %215 = memref.load %arg1[%c15] : memref<36xf32, #tpu.memory_space<smem>>
    %c2_106 = arith.constant 2 : index
    %c76_107 = arith.constant 76 : index
    %c0_108 = arith.constant 0 : index
    %216 = vector.load %arg0[%c2_106, %c76_107, %c0_108] : memref<3x123x128xf32, #tpu.memory_space<vmem>>, vector<1x1x128xf32>
    %217 = vector.shape_cast %216 : vector<1x1x128xf32> to vector<1x128xf32>
    %218 = vector.broadcast %215 : f32 to vector<1x128xf32>
    %219 = arith.mulf %218, %217 : vector<1x128xf32>
    %220 = arith.addf %214, %219 : vector<1x128xf32>
    %c16_109 = arith.constant 16 : index
    %221 = memref.load %arg1[%c16_109] : memref<36xf32, #tpu.memory_space<smem>>
    %c2_110 = arith.constant 2 : index
    %c77_111 = arith.constant 77 : index
    %c0_112 = arith.constant 0 : index
    %222 = vector.load %arg0[%c2_110, %c77_111, %c0_112] : memref<3x123x128xf32, #tpu.memory_space<vmem>>, vector<1x1x128xf32>
    %223 = vector.shape_cast %222 : vector<1x1x128xf32> to vector<1x128xf32>
    %224 = vector.broadcast %221 : f32 to vector<1x128xf32>
    %225 = arith.mulf %224, %223 : vector<1x128xf32>
    %226 = arith.addf %220, %225 : vector<1x128xf32>
    %c17_113 = arith.constant 17 : index
    %227 = memref.load %arg1[%c17_113] : memref<36xf32, #tpu.memory_space<smem>>
    %c2_114 = arith.constant 2 : index
    %c78_115 = arith.constant 78 : index
    %c0_116 = arith.constant 0 : index
    %228 = vector.load %arg0[%c2_114, %c78_115, %c0_116] : memref<3x123x128xf32, #tpu.memory_space<vmem>>, vector<1x1x128xf32>
    %229 = vector.shape_cast %228 : vector<1x1x128xf32> to vector<1x128xf32>
    %230 = vector.broadcast %227 : f32 to vector<1x128xf32>
    %231 = arith.mulf %230, %229 : vector<1x128xf32>
    %232 = arith.addf %226, %231 : vector<1x128xf32>
    %233 = tpu.concatenate %176, %232 in 0 : vector<1x128xf32>, vector<1x128xf32> -> vector<2x128xf32>
    %234 = vector.shape_cast %233 : vector<2x128xf32> to vector<1x2x128xf32>
    %cst_117 = arith.constant dense<0.000000e+00> : vector<1xf32>
    %235 = vector.multi_reduction <add>, %234, %cst_117 [1, 2] : vector<1x2x128xf32> to vector<1xf32>
    %236 = vector.shape_cast %235 : vector<1xf32> to vector<1x1x1xf32>
    %237 = vector.extract %236[0, 0, 0] : f32 from vector<1x1x1xf32>
    %238 = vector.broadcast %237 : f32 to vector<1x1xf32>
    %239 = arith.mulf %233, %233 : vector<2x128xf32>
    %240 = vector.shape_cast %239 : vector<2x128xf32> to vector<1x2x128xf32>
    %cst_118 = arith.constant dense<0.000000e+00> : vector<1xf32>
    %241 = vector.multi_reduction <add>, %240, %cst_118 [1, 2] : vector<1x2x128xf32> to vector<1xf32>
    %242 = vector.shape_cast %241 : vector<1xf32> to vector<1x1x1xf32>
    %243 = vector.extract %242[0, 0, 0] : f32 from vector<1x1x1xf32>
    %244 = vector.broadcast %243 : f32 to vector<1x1xf32>
    %cst_119 = arith.constant 3.906250e-03 : f32
    %245 = vector.broadcast %cst_119 : f32 to vector<1x1xf32>
    %246 = arith.mulf %238, %245 : vector<1x1xf32>
    %cst_120 = arith.constant 3.906250e-03 : f32
    %247 = vector.broadcast %cst_120 : f32 to vector<1x1xf32>
    %248 = arith.mulf %244, %247 : vector<1x1xf32>
    %249 = arith.mulf %246, %246 : vector<1x1xf32>
    %250 = arith.subf %248, %249 : vector<1x1xf32>
    %c1_121 = arith.constant 1 : index
    %251 = memref.load %arg3[%c1_121] : memref<4xf32, #tpu.memory_space<smem>>
    %cst_122 = arith.constant 9.99999974E-6 : f32
    %252 = vector.broadcast %cst_122 : f32 to vector<1x1xf32>
    %253 = arith.addf %250, %252 : vector<1x1xf32>
    %254 = math.rsqrt %253 : vector<1x1xf32>
    %255 = vector.broadcast %251 : f32 to vector<1x1xf32>
    %256 = arith.mulf %255, %254 : vector<1x1xf32>
    %c1_123 = arith.constant 1 : index
    %257 = memref.load %arg4[%c1_123] : memref<4xf32, #tpu.memory_space<smem>>
    %258 = arith.mulf %246, %256 : vector<1x1xf32>
    %259 = vector.broadcast %257 : f32 to vector<1x1xf32>
    %260 = arith.subf %259, %258 : vector<1x1xf32>
    %261 = vector.broadcast %256 : vector<1x1xf32> to vector<2x128xf32>
    %262 = arith.mulf %233, %261 : vector<2x128xf32>
    %263 = vector.broadcast %260 : vector<1x1xf32> to vector<2x128xf32>
    %264 = arith.addf %262, %263 : vector<2x128xf32>
    %cst_124 = arith.constant 3.000000e+00 : f32
    %265 = vector.broadcast %cst_124 : f32 to vector<2x128xf32>
    %266 = arith.addf %264, %265 : vector<2x128xf32>
    %cst_125 = arith.constant 0.000000e+00 : f32
    %cst_126 = arith.constant 6.000000e+00 : f32
    %267 = vector.broadcast %cst_125 : f32 to vector<2x128xf32>
    %268 = arith.maximumf %267, %266 : vector<2x128xf32>
    %269 = vector.broadcast %cst_126 : f32 to vector<2x128xf32>
    %270 = arith.minimumf %269, %268 : vector<2x128xf32>
    %cst_127 = arith.constant 3.000000e+00 : f32
    %271 = vector.broadcast %cst_127 : f32 to vector<2x128xf32>
    %272 = arith.subf %270, %271 : vector<2x128xf32>
    %cst_128 = arith.constant 0.333333343 : f32
    %273 = vector.broadcast %cst_128 : f32 to vector<2x128xf32>
    %274 = arith.mulf %272, %273 : vector<2x128xf32>
    %c1_129 = arith.constant 1 : index
    %c0_130 = arith.constant 0 : index
    %c0_131 = arith.constant 0 : index
    %275 = vector.load %arg5[%c1_129, %c0_130, %c0_131] : memref<4x2x128xf32, #tpu.memory_space<vmem>>, vector<1x2x128xf32>
    %276 = vector.shape_cast %275 : vector<1x2x128xf32> to vector<2x128xf32>
    %277 = vector.shape_cast %274 : vector<2x128xf32> to vector<1x2x128xf32>
    tpu.vector_store %arg5[%c1_129, %c0_130, %c0_131], %277 {strides = array<i32>} : memref<4x2x128xf32, #tpu.memory_space<vmem>>, vector<1x2x128xf32>,
    %c2_132 = arith.constant 2 : index
    %278 = memref.load %arg2[%c2_132] : memref<4xf32, #tpu.memory_space<smem>>
    %279 = vector.broadcast %278 : f32 to vector<1x128xf32>
    %c19 = arith.constant 19 : index
    %280 = memref.load %arg1[%c19] : memref<36xf32, #tpu.memory_space<smem>>
    %c0_133 = arith.constant 0 : index
    %c0_134 = arith.constant 0 : index
    %c0_135 = arith.constant 0 : index
    %281 = vector.load %arg0[%c0_133, %c0_134, %c0_135] : memref<3x123x128xf32, #tpu.memory_space<vmem>>, vector<1x1x128xf32>
    %282 = vector.shape_cast %281 : vector<1x1x128xf32> to vector<1x128xf32>
    %283 = vector.broadcast %280 : f32 to vector<1x128xf32>
    %284 = arith.mulf %283, %282 : vector<1x128xf32>
    %285 = arith.addf %279, %284 : vector<1x128xf32>
    %c20 = arith.constant 20 : index
    %286 = memref.load %arg1[%c20] : memref<36xf32, #tpu.memory_space<smem>>
    %c0_136 = arith.constant 0 : index
    %c1_137 = arith.constant 1 : index
    %c0_138 = arith.constant 0 : index
    %287 = vector.load %arg0[%c0_136, %c1_137, %c0_138] : memref<3x123x128xf32, #tpu.memory_space<vmem>>, vector<1x1x128xf32>
    %288 = vector.shape_cast %287 : vector<1x1x128xf32> to vector<1x128xf32>
    %289 = vector.broadcast %286 : f32 to vector<1x128xf32>
    %290 = arith.mulf %289, %288 : vector<1x128xf32>
    %291 = arith.addf %285, %290 : vector<1x128xf32>
    %c22 = arith.constant 22 : index
    %292 = memref.load %arg1[%c22] : memref<36xf32, #tpu.memory_space<smem>>
    %c1_139 = arith.constant 1 : index
    %c0_140 = arith.constant 0 : index
    %c0_141 = arith.constant 0 : index
    %293 = vector.load %arg0[%c1_139, %c0_140, %c0_141] : memref<3x123x128xf32, #tpu.memory_space<vmem>>, vector<1x1x128xf32>
    %294 = vector.shape_cast %293 : vector<1x1x128xf32> to vector<1x128xf32>
    %295 = vector.broadcast %292 : f32 to vector<1x128xf32>
    %296 = arith.mulf %295, %294 : vector<1x128xf32>
    %297 = arith.addf %291, %296 : vector<1x128xf32>
    %c23 = arith.constant 23 : index
    %298 = memref.load %arg1[%c23] : memref<36xf32, #tpu.memory_space<smem>>
    %c1_142 = arith.constant 1 : index
    %c1_143 = arith.constant 1 : index
    %c0_144 = arith.constant 0 : index
    %299 = vector.load %arg0[%c1_142, %c1_143, %c0_144] : memref<3x123x128xf32, #tpu.memory_space<vmem>>, vector<1x1x128xf32>
    %300 = vector.shape_cast %299 : vector<1x1x128xf32> to vector<1x128xf32>
    %301 = vector.broadcast %298 : f32 to vector<1x128xf32>
    %302 = arith.mulf %301, %300 : vector<1x128xf32>
    %303 = arith.addf %297, %302 : vector<1x128xf32>
    %c25 = arith.constant 25 : index
    %304 = memref.load %arg1[%c25] : memref<36xf32, #tpu.memory_space<smem>>
    %c2_145 = arith.constant 2 : index
    %c0_146 = arith.constant 0 : index
    %c0_147 = arith.constant 0 : index
    %305 = vector.load %arg0[%c2_145, %c0_146, %c0_147] : memref<3x123x128xf32, #tpu.memory_space<vmem>>, vector<1x1x128xf32>
    %306 = vector.shape_cast %305 : vector<1x1x128xf32> to vector<1x128xf32>
    %307 = vector.broadcast %304 : f32 to vector<1x128xf32>
    %308 = arith.mulf %307, %306 : vector<1x128xf32>
    %309 = arith.addf %303, %308 : vector<1x128xf32>
    %c26 = arith.constant 26 : index
    %310 = memref.load %arg1[%c26] : memref<36xf32, #tpu.memory_space<smem>>
    %c2_148 = arith.constant 2 : index
    %c1_149 = arith.constant 1 : index
    %c0_150 = arith.constant 0 : index
    %311 = vector.load %arg0[%c2_148, %c1_149, %c0_150] : memref<3x123x128xf32, #tpu.memory_space<vmem>>, vector<1x1x128xf32>
    %312 = vector.shape_cast %311 : vector<1x1x128xf32> to vector<1x128xf32>
    %313 = vector.broadcast %310 : f32 to vector<1x128xf32>
    %314 = arith.mulf %313, %312 : vector<1x128xf32>
    %315 = arith.addf %309, %314 : vector<1x128xf32>
    %c2_151 = arith.constant 2 : index
    %316 = memref.load %arg2[%c2_151] : memref<4xf32, #tpu.memory_space<smem>>
    %317 = vector.broadcast %316 : f32 to vector<1x128xf32>
    %c18 = arith.constant 18 : index
    %318 = memref.load %arg1[%c18] : memref<36xf32, #tpu.memory_space<smem>>
    %c0_152 = arith.constant 0 : index
    %c76_153 = arith.constant 76 : index
    %c0_154 = arith.constant 0 : index
    %319 = vector.load %arg0[%c0_152, %c76_153, %c0_154] : memref<3x123x128xf32, #tpu.memory_space<vmem>>, vector<1x1x128xf32>
    %320 = vector.shape_cast %319 : vector<1x1x128xf32> to vector<1x128xf32>
    %321 = vector.broadcast %318 : f32 to vector<1x128xf32>
    %322 = arith.mulf %321, %320 : vector<1x128xf32>
    %323 = arith.addf %317, %322 : vector<1x128xf32>
    %c19_155 = arith.constant 19 : index
    %324 = memref.load %arg1[%c19_155] : memref<36xf32, #tpu.memory_space<smem>>
    %c0_156 = arith.constant 0 : index
    %c77_157 = arith.constant 77 : index
    %c0_158 = arith.constant 0 : index
    %325 = vector.load %arg0[%c0_156, %c77_157, %c0_158] : memref<3x123x128xf32, #tpu.memory_space<vmem>>, vector<1x1x128xf32>
    %326 = vector.shape_cast %325 : vector<1x1x128xf32> to vector<1x128xf32>
    %327 = vector.broadcast %324 : f32 to vector<1x128xf32>
    %328 = arith.mulf %327, %326 : vector<1x128xf32>
    %329 = arith.addf %323, %328 : vector<1x128xf32>
    %c20_159 = arith.constant 20 : index
    %330 = memref.load %arg1[%c20_159] : memref<36xf32, #tpu.memory_space<smem>>
    %c0_160 = arith.constant 0 : index
    %c78_161 = arith.constant 78 : index
    %c0_162 = arith.constant 0 : index
    %331 = vector.load %arg0[%c0_160, %c78_161, %c0_162] : memref<3x123x128xf32, #tpu.memory_space<vmem>>, vector<1x1x128xf32>
    %332 = vector.shape_cast %331 : vector<1x1x128xf32> to vector<1x128xf32>
    %333 = vector.broadcast %330 : f32 to vector<1x128xf32>
    %334 = arith.mulf %333, %332 : vector<1x128xf32>
    %335 = arith.addf %329, %334 : vector<1x128xf32>
    %c21 = arith.constant 21 : index
    %336 = memref.load %arg1[%c21] : memref<36xf32, #tpu.memory_space<smem>>
    %c1_163 = arith.constant 1 : index
    %c76_164 = arith.constant 76 : index
    %c0_165 = arith.constant 0 : index
    %337 = vector.load %arg0[%c1_163, %c76_164, %c0_165] : memref<3x123x128xf32, #tpu.memory_space<vmem>>, vector<1x1x128xf32>
    %338 = vector.shape_cast %337 : vector<1x1x128xf32> to vector<1x128xf32>
    %339 = vector.broadcast %336 : f32 to vector<1x128xf32>
    %340 = arith.mulf %339, %338 : vector<1x128xf32>
    %341 = arith.addf %335, %340 : vector<1x128xf32>
    %c22_166 = arith.constant 22 : index
    %342 = memref.load %arg1[%c22_166] : memref<36xf32, #tpu.memory_space<smem>>
    %c1_167 = arith.constant 1 : index
    %c77_168 = arith.constant 77 : index
    %c0_169 = arith.constant 0 : index
    %343 = vector.load %arg0[%c1_167, %c77_168, %c0_169] : memref<3x123x128xf32, #tpu.memory_space<vmem>>, vector<1x1x128xf32>
    %344 = vector.shape_cast %343 : vector<1x1x128xf32> to vector<1x128xf32>
    %345 = vector.broadcast %342 : f32 to vector<1x128xf32>
    %346 = arith.mulf %345, %344 : vector<1x128xf32>
    %347 = arith.addf %341, %346 : vector<1x128xf32>
    %c23_170 = arith.constant 23 : index
    %348 = memref.load %arg1[%c23_170] : memref<36xf32, #tpu.memory_space<smem>>
    %c1_171 = arith.constant 1 : index
    %c78_172 = arith.constant 78 : index
    %c0_173 = arith.constant 0 : index
    %349 = vector.load %arg0[%c1_171, %c78_172, %c0_173] : memref<3x123x128xf32, #tpu.memory_space<vmem>>, vector<1x1x128xf32>
    %350 = vector.shape_cast %349 : vector<1x1x128xf32> to vector<1x128xf32>
    %351 = vector.broadcast %348 : f32 to vector<1x128xf32>
    %352 = arith.mulf %351, %350 : vector<1x128xf32>
    %353 = arith.addf %347, %352 : vector<1x128xf32>
    %c24 = arith.constant 24 : index
    %354 = memref.load %arg1[%c24] : memref<36xf32, #tpu.memory_space<smem>>
    %c2_174 = arith.constant 2 : index
    %c76_175 = arith.constant 76 : index
    %c0_176 = arith.constant 0 : index
    %355 = vector.load %arg0[%c2_174, %c76_175, %c0_176] : memref<3x123x128xf32, #tpu.memory_space<vmem>>, vector<1x1x128xf32>
    %356 = vector.shape_cast %355 : vector<1x1x128xf32> to vector<1x128xf32>
    %357 = vector.broadcast %354 : f32 to vector<1x128xf32>
    %358 = arith.mulf %357, %356 : vector<1x128xf32>
    %359 = arith.addf %353, %358 : vector<1x128xf32>
    %c25_177 = arith.constant 25 : index
    %360 = memref.load %arg1[%c25_177] : memref<36xf32, #tpu.memory_space<smem>>
    %c2_178 = arith.constant 2 : index
    %c77_179 = arith.constant 77 : index
    %c0_180 = arith.constant 0 : index
    %361 = vector.load %arg0[%c2_178, %c77_179, %c0_180] : memref<3x123x128xf32, #tpu.memory_space<vmem>>, vector<1x1x128xf32>
    %362 = vector.shape_cast %361 : vector<1x1x128xf32> to vector<1x128xf32>
    %363 = vector.broadcast %360 : f32 to vector<1x128xf32>
    %364 = arith.mulf %363, %362 : vector<1x128xf32>
    %365 = arith.addf %359, %364 : vector<1x128xf32>
    %c26_181 = arith.constant 26 : index
    %366 = memref.load %arg1[%c26_181] : memref<36xf32, #tpu.memory_space<smem>>
    %c2_182 = arith.constant 2 : index
    %c78_183 = arith.constant 78 : index
    %c0_184 = arith.constant 0 : index
    %367 = vector.load %arg0[%c2_182, %c78_183, %c0_184] : memref<3x123x128xf32, #tpu.memory_space<vmem>>, vector<1x1x128xf32>
    %368 = vector.shape_cast %367 : vector<1x1x128xf32> to vector<1x128xf32>
    %369 = vector.broadcast %366 : f32 to vector<1x128xf32>
    %370 = arith.mulf %369, %368 : vector<1x128xf32>
    %371 = arith.addf %365, %370 : vector<1x128xf32>
    %372 = tpu.concatenate %315, %371 in 0 : vector<1x128xf32>, vector<1x128xf32> -> vector<2x128xf32>
    %373 = vector.shape_cast %372 : vector<2x128xf32> to vector<1x2x128xf32>
    %cst_185 = arith.constant dense<0.000000e+00> : vector<1xf32>
    %374 = vector.multi_reduction <add>, %373, %cst_185 [1, 2] : vector<1x2x128xf32> to vector<1xf32>
    %375 = vector.shape_cast %374 : vector<1xf32> to vector<1x1x1xf32>
    %376 = vector.extract %375[0, 0, 0] : f32 from vector<1x1x1xf32>
    %377 = vector.broadcast %376 : f32 to vector<1x1xf32>
    %378 = arith.mulf %372, %372 : vector<2x128xf32>
    %379 = vector.shape_cast %378 : vector<2x128xf32> to vector<1x2x128xf32>
    %cst_186 = arith.constant dense<0.000000e+00> : vector<1xf32>
    %380 = vector.multi_reduction <add>, %379, %cst_186 [1, 2] : vector<1x2x128xf32> to vector<1xf32>
    %381 = vector.shape_cast %380 : vector<1xf32> to vector<1x1x1xf32>
    %382 = vector.extract %381[0, 0, 0] : f32 from vector<1x1x1xf32>
    %383 = vector.broadcast %382 : f32 to vector<1x1xf32>
    %cst_187 = arith.constant 3.906250e-03 : f32
    %384 = vector.broadcast %cst_187 : f32 to vector<1x1xf32>
    %385 = arith.mulf %377, %384 : vector<1x1xf32>
    %cst_188 = arith.constant 3.906250e-03 : f32
    %386 = vector.broadcast %cst_188 : f32 to vector<1x1xf32>
    %387 = arith.mulf %383, %386 : vector<1x1xf32>
    %388 = arith.mulf %385, %385 : vector<1x1xf32>
    %389 = arith.subf %387, %388 : vector<1x1xf32>
    %c2_189 = arith.constant 2 : index
    %390 = memref.load %arg3[%c2_189] : memref<4xf32, #tpu.memory_space<smem>>
    %cst_190 = arith.constant 9.99999974E-6 : f32
    %391 = vector.broadcast %cst_190 : f32 to vector<1x1xf32>
    %392 = arith.addf %389, %391 : vector<1x1xf32>
    %393 = math.rsqrt %392 : vector<1x1xf32>
    %394 = vector.broadcast %390 : f32 to vector<1x1xf32>
    %395 = arith.mulf %394, %393 : vector<1x1xf32>
    %c2_191 = arith.constant 2 : index
    %396 = memref.load %arg4[%c2_191] : memref<4xf32, #tpu.memory_space<smem>>
    %397 = arith.mulf %385, %395 : vector<1x1xf32>
    %398 = vector.broadcast %396 : f32 to vector<1x1xf32>
    %399 = arith.subf %398, %397 : vector<1x1xf32>
    %400 = vector.broadcast %395 : vector<1x1xf32> to vector<2x128xf32>
    %401 = arith.mulf %372, %400 : vector<2x128xf32>
    %402 = vector.broadcast %399 : vector<1x1xf32> to vector<2x128xf32>
    %403 = arith.addf %401, %402 : vector<2x128xf32>
    %cst_192 = arith.constant 3.000000e+00 : f32
    %404 = vector.broadcast %cst_192 : f32 to vector<2x128xf32>
    %405 = arith.addf %403, %404 : vector<2x128xf32>
    %cst_193 = arith.constant 0.000000e+00 : f32
    %cst_194 = arith.constant 6.000000e+00 : f32
    %406 = vector.broadcast %cst_193 : f32 to vector<2x128xf32>
    %407 = arith.maximumf %406, %405 : vector<2x128xf32>
    %408 = vector.broadcast %cst_194 : f32 to vector<2x128xf32>
    %409 = arith.minimumf %408, %407 : vector<2x128xf32>
    %cst_195 = arith.constant 3.000000e+00 : f32
    %410 = vector.broadcast %cst_195 : f32 to vector<2x128xf32>
    %411 = arith.subf %409, %410 : vector<2x128xf32>
    %cst_196 = arith.constant 0.333333343 : f32
    %412 = vector.broadcast %cst_196 : f32 to vector<2x128xf32>
    %413 = arith.mulf %411, %412 : vector<2x128xf32>
    %c2_197 = arith.constant 2 : index
    %c0_198 = arith.constant 0 : index
    %c0_199 = arith.constant 0 : index
    %414 = vector.load %arg5[%c2_197, %c0_198, %c0_199] : memref<4x2x128xf32, #tpu.memory_space<vmem>>, vector<1x2x128xf32>
    %415 = vector.shape_cast %414 : vector<1x2x128xf32> to vector<2x128xf32>
    %416 = vector.shape_cast %413 : vector<2x128xf32> to vector<1x2x128xf32>
    tpu.vector_store %arg5[%c2_197, %c0_198, %c0_199], %416 {strides = array<i32>} : memref<4x2x128xf32, #tpu.memory_space<vmem>>, vector<1x2x128xf32>,
    %c3_200 = arith.constant 3 : index
    %417 = memref.load %arg2[%c3_200] : memref<4xf32, #tpu.memory_space<smem>>
    %418 = vector.broadcast %417 : f32 to vector<1x128xf32>
    %c28 = arith.constant 28 : index
    %419 = memref.load %arg1[%c28] : memref<36xf32, #tpu.memory_space<smem>>
    %c0_201 = arith.constant 0 : index
    %c0_202 = arith.constant 0 : index
    %c0_203 = arith.constant 0 : index
    %420 = vector.load %arg0[%c0_201, %c0_202, %c0_203] : memref<3x123x128xf32, #tpu.memory_space<vmem>>, vector<1x1x128xf32>
    %421 = vector.shape_cast %420 : vector<1x1x128xf32> to vector<1x128xf32>
    %422 = vector.broadcast %419 : f32 to vector<1x128xf32>
    %423 = arith.mulf %422, %421 : vector<1x128xf32>
    %424 = arith.addf %418, %423 : vector<1x128xf32>
    %c29 = arith.constant 29 : index
    %425 = memref.load %arg1[%c29] : memref<36xf32, #tpu.memory_space<smem>>
    %c0_204 = arith.constant 0 : index
    %c1_205 = arith.constant 1 : index
    %c0_206 = arith.constant 0 : index
    %426 = vector.load %arg0[%c0_204, %c1_205, %c0_206] : memref<3x123x128xf32, #tpu.memory_space<vmem>>, vector<1x1x128xf32>
    %427 = vector.shape_cast %426 : vector<1x1x128xf32> to vector<1x128xf32>
    %428 = vector.broadcast %425 : f32 to vector<1x128xf32>
    %429 = arith.mulf %428, %427 : vector<1x128xf32>
    %430 = arith.addf %424, %429 : vector<1x128xf32>
    %c31 = arith.constant 31 : index
    %431 = memref.load %arg1[%c31] : memref<36xf32, #tpu.memory_space<smem>>
    %c1_207 = arith.constant 1 : index
    %c0_208 = arith.constant 0 : index
    %c0_209 = arith.constant 0 : index
    %432 = vector.load %arg0[%c1_207, %c0_208, %c0_209] : memref<3x123x128xf32, #tpu.memory_space<vmem>>, vector<1x1x128xf32>
    %433 = vector.shape_cast %432 : vector<1x1x128xf32> to vector<1x128xf32>
    %434 = vector.broadcast %431 : f32 to vector<1x128xf32>
    %435 = arith.mulf %434, %433 : vector<1x128xf32>
    %436 = arith.addf %430, %435 : vector<1x128xf32>
    %c32 = arith.constant 32 : index
    %437 = memref.load %arg1[%c32] : memref<36xf32, #tpu.memory_space<smem>>
    %c1_210 = arith.constant 1 : index
    %c1_211 = arith.constant 1 : index
    %c0_212 = arith.constant 0 : index
    %438 = vector.load %arg0[%c1_210, %c1_211, %c0_212] : memref<3x123x128xf32, #tpu.memory_space<vmem>>, vector<1x1x128xf32>
    %439 = vector.shape_cast %438 : vector<1x1x128xf32> to vector<1x128xf32>
    %440 = vector.broadcast %437 : f32 to vector<1x128xf32>
    %441 = arith.mulf %440, %439 : vector<1x128xf32>
    %442 = arith.addf %436, %441 : vector<1x128xf32>
    %c34 = arith.constant 34 : index
    %443 = memref.load %arg1[%c34] : memref<36xf32, #tpu.memory_space<smem>>
    %c2_213 = arith.constant 2 : index
    %c0_214 = arith.constant 0 : index
    %c0_215 = arith.constant 0 : index
    %444 = vector.load %arg0[%c2_213, %c0_214, %c0_215] : memref<3x123x128xf32, #tpu.memory_space<vmem>>, vector<1x1x128xf32>
    %445 = vector.shape_cast %444 : vector<1x1x128xf32> to vector<1x128xf32>
    %446 = vector.broadcast %443 : f32 to vector<1x128xf32>
    %447 = arith.mulf %446, %445 : vector<1x128xf32>
    %448 = arith.addf %442, %447 : vector<1x128xf32>
    %c35 = arith.constant 35 : index
    %449 = memref.load %arg1[%c35] : memref<36xf32, #tpu.memory_space<smem>>
    %c2_216 = arith.constant 2 : index
    %c1_217 = arith.constant 1 : index
    %c0_218 = arith.constant 0 : index
    %450 = vector.load %arg0[%c2_216, %c1_217, %c0_218] : memref<3x123x128xf32, #tpu.memory_space<vmem>>, vector<1x1x128xf32>
    %451 = vector.shape_cast %450 : vector<1x1x128xf32> to vector<1x128xf32>
    %452 = vector.broadcast %449 : f32 to vector<1x128xf32>
    %453 = arith.mulf %452, %451 : vector<1x128xf32>
    %454 = arith.addf %448, %453 : vector<1x128xf32>
    %c3_219 = arith.constant 3 : index
    %455 = memref.load %arg2[%c3_219] : memref<4xf32, #tpu.memory_space<smem>>
    %456 = vector.broadcast %455 : f32 to vector<1x128xf32>
    %c27 = arith.constant 27 : index
    %457 = memref.load %arg1[%c27] : memref<36xf32, #tpu.memory_space<smem>>
    %c0_220 = arith.constant 0 : index
    %c76_221 = arith.constant 76 : index
    %c0_222 = arith.constant 0 : index
    %458 = vector.load %arg0[%c0_220, %c76_221, %c0_222] : memref<3x123x128xf32, #tpu.memory_space<vmem>>, vector<1x1x128xf32>
    %459 = vector.shape_cast %458 : vector<1x1x128xf32> to vector<1x128xf32>
    %460 = vector.broadcast %457 : f32 to vector<1x128xf32>
    %461 = arith.mulf %460, %459 : vector<1x128xf32>
    %462 = arith.addf %456, %461 : vector<1x128xf32>
    %c28_223 = arith.constant 28 : index
    %463 = memref.load %arg1[%c28_223] : memref<36xf32, #tpu.memory_space<smem>>
    %c0_224 = arith.constant 0 : index
    %c77_225 = arith.constant 77 : index
    %c0_226 = arith.constant 0 : index
    %464 = vector.load %arg0[%c0_224, %c77_225, %c0_226] : memref<3x123x128xf32, #tpu.memory_space<vmem>>, vector<1x1x128xf32>
    %465 = vector.shape_cast %464 : vector<1x1x128xf32> to vector<1x128xf32>
    %466 = vector.broadcast %463 : f32 to vector<1x128xf32>
    %467 = arith.mulf %466, %465 : vector<1x128xf32>
    %468 = arith.addf %462, %467 : vector<1x128xf32>
    %c29_227 = arith.constant 29 : index
    %469 = memref.load %arg1[%c29_227] : memref<36xf32, #tpu.memory_space<smem>>
    %c0_228 = arith.constant 0 : index
    %c78_229 = arith.constant 78 : index
    %c0_230 = arith.constant 0 : index
    %470 = vector.load %arg0[%c0_228, %c78_229, %c0_230] : memref<3x123x128xf32, #tpu.memory_space<vmem>>, vector<1x1x128xf32>
    %471 = vector.shape_cast %470 : vector<1x1x128xf32> to vector<1x128xf32>
    %472 = vector.broadcast %469 : f32 to vector<1x128xf32>
    %473 = arith.mulf %472, %471 : vector<1x128xf32>
    %474 = arith.addf %468, %473 : vector<1x128xf32>
    %c30 = arith.constant 30 : index
    %475 = memref.load %arg1[%c30] : memref<36xf32, #tpu.memory_space<smem>>
    %c1_231 = arith.constant 1 : index
    %c76_232 = arith.constant 76 : index
    %c0_233 = arith.constant 0 : index
    %476 = vector.load %arg0[%c1_231, %c76_232, %c0_233] : memref<3x123x128xf32, #tpu.memory_space<vmem>>, vector<1x1x128xf32>
    %477 = vector.shape_cast %476 : vector<1x1x128xf32> to vector<1x128xf32>
    %478 = vector.broadcast %475 : f32 to vector<1x128xf32>
    %479 = arith.mulf %478, %477 : vector<1x128xf32>
    %480 = arith.addf %474, %479 : vector<1x128xf32>
    %c31_234 = arith.constant 31 : index
    %481 = memref.load %arg1[%c31_234] : memref<36xf32, #tpu.memory_space<smem>>
    %c1_235 = arith.constant 1 : index
    %c77_236 = arith.constant 77 : index
    %c0_237 = arith.constant 0 : index
    %482 = vector.load %arg0[%c1_235, %c77_236, %c0_237] : memref<3x123x128xf32, #tpu.memory_space<vmem>>, vector<1x1x128xf32>
    %483 = vector.shape_cast %482 : vector<1x1x128xf32> to vector<1x128xf32>
    %484 = vector.broadcast %481 : f32 to vector<1x128xf32>
    %485 = arith.mulf %484, %483 : vector<1x128xf32>
    %486 = arith.addf %480, %485 : vector<1x128xf32>
    %c32_238 = arith.constant 32 : index
    %487 = memref.load %arg1[%c32_238] : memref<36xf32, #tpu.memory_space<smem>>
    %c1_239 = arith.constant 1 : index
    %c78_240 = arith.constant 78 : index
    %c0_241 = arith.constant 0 : index
    %488 = vector.load %arg0[%c1_239, %c78_240, %c0_241] : memref<3x123x128xf32, #tpu.memory_space<vmem>>, vector<1x1x128xf32>
    %489 = vector.shape_cast %488 : vector<1x1x128xf32> to vector<1x128xf32>
    %490 = vector.broadcast %487 : f32 to vector<1x128xf32>
    %491 = arith.mulf %490, %489 : vector<1x128xf32>
    %492 = arith.addf %486, %491 : vector<1x128xf32>
    %c33 = arith.constant 33 : index
    %493 = memref.load %arg1[%c33] : memref<36xf32, #tpu.memory_space<smem>>
    %c2_242 = arith.constant 2 : index
    %c76_243 = arith.constant 76 : index
    %c0_244 = arith.constant 0 : index
    %494 = vector.load %arg0[%c2_242, %c76_243, %c0_244] : memref<3x123x128xf32, #tpu.memory_space<vmem>>, vector<1x1x128xf32>
    %495 = vector.shape_cast %494 : vector<1x1x128xf32> to vector<1x128xf32>
    %496 = vector.broadcast %493 : f32 to vector<1x128xf32>
    %497 = arith.mulf %496, %495 : vector<1x128xf32>
    %498 = arith.addf %492, %497 : vector<1x128xf32>
    %c34_245 = arith.constant 34 : index
    %499 = memref.load %arg1[%c34_245] : memref<36xf32, #tpu.memory_space<smem>>
    %c2_246 = arith.constant 2 : index
    %c77_247 = arith.constant 77 : index
    %c0_248 = arith.constant 0 : index
    %500 = vector.load %arg0[%c2_246, %c77_247, %c0_248] : memref<3x123x128xf32, #tpu.memory_space<vmem>>, vector<1x1x128xf32>
    %501 = vector.shape_cast %500 : vector<1x1x128xf32> to vector<1x128xf32>
    %502 = vector.broadcast %499 : f32 to vector<1x128xf32>
    %503 = arith.mulf %502, %501 : vector<1x128xf32>
    %504 = arith.addf %498, %503 : vector<1x128xf32>
    %c35_249 = arith.constant 35 : index
    %505 = memref.load %arg1[%c35_249] : memref<36xf32, #tpu.memory_space<smem>>
    %c2_250 = arith.constant 2 : index
    %c78_251 = arith.constant 78 : index
    %c0_252 = arith.constant 0 : index
    %506 = vector.load %arg0[%c2_250, %c78_251, %c0_252] : memref<3x123x128xf32, #tpu.memory_space<vmem>>, vector<1x1x128xf32>
    %507 = vector.shape_cast %506 : vector<1x1x128xf32> to vector<1x128xf32>
    %508 = vector.broadcast %505 : f32 to vector<1x128xf32>
    %509 = arith.mulf %508, %507 : vector<1x128xf32>
    %510 = arith.addf %504, %509 : vector<1x128xf32>
    %511 = tpu.concatenate %454, %510 in 0 : vector<1x128xf32>, vector<1x128xf32> -> vector<2x128xf32>
    %512 = vector.shape_cast %511 : vector<2x128xf32> to vector<1x2x128xf32>
    %cst_253 = arith.constant dense<0.000000e+00> : vector<1xf32>
    %513 = vector.multi_reduction <add>, %512, %cst_253 [1, 2] : vector<1x2x128xf32> to vector<1xf32>
    %514 = vector.shape_cast %513 : vector<1xf32> to vector<1x1x1xf32>
    %515 = vector.extract %514[0, 0, 0] : f32 from vector<1x1x1xf32>
    %516 = vector.broadcast %515 : f32 to vector<1x1xf32>
    %517 = arith.mulf %511, %511 : vector<2x128xf32>
    %518 = vector.shape_cast %517 : vector<2x128xf32> to vector<1x2x128xf32>
    %cst_254 = arith.constant dense<0.000000e+00> : vector<1xf32>
    %519 = vector.multi_reduction <add>, %518, %cst_254 [1, 2] : vector<1x2x128xf32> to vector<1xf32>
    %520 = vector.shape_cast %519 : vector<1xf32> to vector<1x1x1xf32>
    %521 = vector.extract %520[0, 0, 0] : f32 from vector<1x1x1xf32>
    %522 = vector.broadcast %521 : f32 to vector<1x1xf32>
    %cst_255 = arith.constant 3.906250e-03 : f32
    %523 = vector.broadcast %cst_255 : f32 to vector<1x1xf32>
    %524 = arith.mulf %516, %523 : vector<1x1xf32>
    %cst_256 = arith.constant 3.906250e-03 : f32
    %525 = vector.broadcast %cst_256 : f32 to vector<1x1xf32>
    %526 = arith.mulf %522, %525 : vector<1x1xf32>
    %527 = arith.mulf %524, %524 : vector<1x1xf32>
    %528 = arith.subf %526, %527 : vector<1x1xf32>
    %c3_257 = arith.constant 3 : index
    %529 = memref.load %arg3[%c3_257] : memref<4xf32, #tpu.memory_space<smem>>
    %cst_258 = arith.constant 9.99999974E-6 : f32
    %530 = vector.broadcast %cst_258 : f32 to vector<1x1xf32>
    %531 = arith.addf %528, %530 : vector<1x1xf32>
    %532 = math.rsqrt %531 : vector<1x1xf32>
    %533 = vector.broadcast %529 : f32 to vector<1x1xf32>
    %534 = arith.mulf %533, %532 : vector<1x1xf32>
    %c3_259 = arith.constant 3 : index
    %535 = memref.load %arg4[%c3_259] : memref<4xf32, #tpu.memory_space<smem>>
    %536 = arith.mulf %524, %534 : vector<1x1xf32>
    %537 = vector.broadcast %535 : f32 to vector<1x1xf32>
    %538 = arith.subf %537, %536 : vector<1x1xf32>
    %539 = vector.broadcast %534 : vector<1x1xf32> to vector<2x128xf32>
    %540 = arith.mulf %511, %539 : vector<2x128xf32>
    %541 = vector.broadcast %538 : vector<1x1xf32> to vector<2x128xf32>
    %542 = arith.addf %540, %541 : vector<2x128xf32>
    %cst_260 = arith.constant 3.000000e+00 : f32
    %543 = vector.broadcast %cst_260 : f32 to vector<2x128xf32>
    %544 = arith.addf %542, %543 : vector<2x128xf32>
    %cst_261 = arith.constant 0.000000e+00 : f32
    %cst_262 = arith.constant 6.000000e+00 : f32
    %545 = vector.broadcast %cst_261 : f32 to vector<2x128xf32>
    %546 = arith.maximumf %545, %544 : vector<2x128xf32>
    %547 = vector.broadcast %cst_262 : f32 to vector<2x128xf32>
    %548 = arith.minimumf %547, %546 : vector<2x128xf32>
    %cst_263 = arith.constant 3.000000e+00 : f32
    %549 = vector.broadcast %cst_263 : f32 to vector<2x128xf32>
    %550 = arith.subf %548, %549 : vector<2x128xf32>
    %cst_264 = arith.constant 0.333333343 : f32
    %551 = vector.broadcast %cst_264 : f32 to vector<2x128xf32>
    %552 = arith.mulf %550, %551 : vector<2x128xf32>
    %c3_265 = arith.constant 3 : index
    %c0_266 = arith.constant 0 : index
    %c0_267 = arith.constant 0 : index
    %553 = vector.load %arg5[%c3_265, %c0_266, %c0_267] : memref<4x2x128xf32, #tpu.memory_space<vmem>>, vector<1x2x128xf32>
    %554 = vector.shape_cast %553 : vector<1x2x128xf32> to vector<2x128xf32>
    %555 = vector.shape_cast %552 : vector<2x128xf32> to vector<1x2x128xf32>
    tpu.vector_store %arg5[%c3_265, %c0_266, %c0_267], %555 {strides = array<i32>} : memref<4x2x128xf32, #tpu.memory_space<vmem>>, vector<1x2x128xf32>,
    return
  }
}

</mosaic_0001>

<bundles_post_ra>
// kernel: tpu_custom_call.1
= control target key start
LH: loop header
LB: loop body
LE: loop exit
PB: predicated region body
PF: predicated region fallthrough
CT: control target
= control target key end

     0   :  { %10 = vsyncpa [#allocation3], 0  ;;  %s1039_s0 = inlined_call_operand.hbm [shape: f32[3,123,128], index: 0, kind: input, shape index: {}]   ;;  %s1040_s1 = inlined_call_operand.hbm [shape: f32[36], index: 1, kind: input, shape index: {}]   ;;  %s1041_s2 = inlined_call_operand.vmem [shape: f32[4], index: 2, kind: input, shape index: {}]   ;;  %s1042_s3 = inlined_call_operand.vmem [shape: f32[4], index: 3, kind: input, shape index: {}]   ;;  %s1043_s4 = inlined_call_operand.vmem [shape: f32[4], index: 4, kind: input, shape index: {}]   ;;  %s1044_s5 = inlined_call_operand.hbm [shape: f32[4,2,128], index: 5, kind: output, shape index: {}]  }
   0x1   :  { %11 = vsyncpa [#allocation5], 0 }
   0x2   :  { %12 = vsyncpa [#allocation6], 0 }
   0x3   :  { %13 = vsyncpa [#allocation10], 0  ;;  %s51_s20 = sshll.u32 %s1042_s3, 4  ;;  %s52_s20 = int_to_ptr.vmem [resolvable:$true] %s51_s20 }
   0x4   :  { %14 = vsyncpa [#allocation4], 0  ;;  %s19_s23 = sshll.u32 %s1039_s0, 4  ;;  %s790_s24 = smov [#allocation9]   ;;  %s20_s23 = int_to_ptr.hbm [resolvable:$true] %s19_s23 }
   0x5   :  { %54 = dma.vmem_to_smem %s52_s20, 16, %s790_s24, [#allocation10]  }
   0x6   :  { %s791_s25 = smov [#allocation2]   ;;  %s792_s27 = smov 128  }
   0x7   :  { %s21_s26 = sshll.u32 %s791_s25, 4  ;;  %s793_s28 = smov 8   ;;  %s22_s26 = int_to_ptr.vmem [resolvable:$true] %s21_s26 }
   0x8   :  { %27 = dma.hbm_to_vmem [thread:$0]  %s20_s23, 6144, %s22_s26, [#allocation3], %s792_s27, %s792_s27, %s793_s28  }
   0x9   :  { %s33_s6 = sshll.u32 %s1040_s1, 4  ;;  %s42_s8 = sshll.u32 %s1041_s2, 4  ;;  %s34_s6 = int_to_ptr.hbm [resolvable:$true] %s33_s6  ;;  %s43_s8 = int_to_ptr.vmem [resolvable:$true] %s42_s8 }
   0xa   :  { %s794_s9 = smov [#allocation7]   ;;  %s795_s0 = smov [#allocation8]  }
   0xb   :  { %36 = dma.hbm_to_smem %s34_s6, 16, %s794_s9, [#allocation5]  }
   0xc   :  { %45 = dma.vmem_to_smem %s43_s8, 16, %s795_s0, [#allocation6]  }
   0xd   :  { %s60_s12 = sshll.u32 %s1043_s4, 4  ;;  %s796_s13 = smov [#allocation11]   ;;  %s61_s12 = int_to_ptr.vmem [resolvable:$true] %s60_s12 }
   0xe   :  { %63 = dma.vmem_to_smem %s61_s12, 16, %s796_s13, [#allocation10]  }
   0xf   :  { %780 = dma.done.wait [#allocation3], 6144  }
  0x10   :  { %781 = vsyncadd [#allocation3], 4294961152 }
  0x11   :  { %782 = dma.done.wait [#allocation5], 16  }
  0x12   :  { %783 = vsyncadd [#allocation5], 4294967280 }
  0x13   :  { %784 = dma.done.wait [#allocation6], 16  }
  0x14   :  { %785 = vsyncadd [#allocation6], 4294967280 }
  0x15   :  { %786 = dma.done.wait [#allocation10], 32  }
  0x16   :  { %787 = vsyncadd [#allocation10], 4294967264 }
  0x17   :  { %84 = sfence }
  0x18   :  { %s845_s1 = sld [smem:[#allocation8 + $0x1]]  ;;  %v214_v0 = vld [vmem:[#allocation2] sm:$0x1]  ;;  %v219_v3 = vld [vmem:[#allocation2 + $0x1] sm:$0x1]  ;;  %vm155_vm0 = vcmask 1040384  }
  0x19   :  { %s612_s2 = sld [smem:[#allocation7 + $0xa]]  ;;  %v244_v8 = vld [vmem:[#allocation2 + $0x4c] sm:$0x1]  ;;  %v248_v9 = vld [vmem:[#allocation2 + $0x4d] sm:$0x1]  ;;  %vm157_vm1 = vcmask 1041408  }
  0x1a   :  { %s847_s14 = sld [smem:[#allocation7 + $0xb]]  ;;  %v224_v10 = vld [vmem:[#allocation2 + $0x80] sm:$0x1]  ;;  %v251_v12 = vld [vmem:[#allocation2 + $0x4e] sm:$0x1] }
  0x1b   :  { %s849_s4 = sld [smem:[#allocation7 + $0xd]]  ;;  %v259_v16 = vld [vmem:[#allocation2 + $0xcd] sm:$0x1]  ;;  %v255_v19 = vld [vmem:[#allocation2 + $0xcc] sm:$0x1] }
  0x1c   :  { %s851_s15 = sld [smem:[#allocation7 + $0xe]]  ;;  %v88_v21 = vld [vmem:[#allocation2] sm:$0x1]  ;;  %v229_v22 = vld [vmem:[#allocation2 + $0x81] sm:$0x1] }
  0x1d   :  { %s853_s16 = sld [smem:[#allocation7 + $0x10]]  ;;  %v93_v25 = vld [vmem:[#allocation2 + $0x1] sm:$0x1]  ;;  %v99_v33 = vld [vmem:[#allocation2 + $0x80] sm:$0x1] }
  0x1e   :  { %s618_s17 = sld [smem:[#allocation7 + $0x9]]  ;;  %v212_v4 = vstv %s845_s1  ;;  %v234_v36 = vld [vmem:[#allocation2 + $0x100] sm:$0x1]  ;;  %v262_v37 = vld [vmem:[#allocation2 + $0xce] sm:$0x1] }
  0x1f   :  { %v215_v1 = vstv %s612_s2  ;;  %s855_s18 = sld [smem:[#allocation7 + $0xc]]  ;;  %v266_v41 = vld [vmem:[#allocation2 + $0x14c] sm:$0x1]  ;;  %v124_v48 = vld [vmem:[#allocation2 + $0x4d] sm:$0x1] }
  0x20   :  { %v216_v2 = vmul.f32 %v215_v1, %v214_v0  ;;  %s857_s19 = sld [smem:[#allocation7 + $0xf]]  ;;  %v220_v5 = vstv %s847_s14  ;;  %v249_v15 = vmul.f32 %v248_v9, %v215_v1  ;;  %v120_v47 = vld [vmem:[#allocation2 + $0x4c] sm:$0x1]  ;;  %v270_v52 = vld [vmem:[#allocation2 + $0x14d] sm:$0x1] }
  0x21   :  { %s861_s20 = sld [smem:[#allocation8]]  ;;  %v221_v7 = vmul.f32 %v220_v5, %v219_v3  ;;  %v225_v13 = vstv %s849_s4  ;;  %v252_v24 = vmul.f32 %v251_v12, %v220_v5  ;;  %v104_v54 = vld [vmem:[#allocation2 + $0x81] sm:$0x1]  ;;  %v127_v60 = vld [vmem:[#allocation2 + $0x4e] sm:$0x1] }
  0x22   :  { %v217_v6 = vadd.f32 %v216_v2, %v212_v4  ;;  %s863_s21 = sld [smem:[#allocation7 + $0x1]]  ;;  %v226_v18 = vmul.f32 %v225_v13, %v224_v10  ;;  %v230_v26 = vstv %s851_s15  ;;  %v260_v27 = vmul.f32 %v259_v16, %v225_v13  ;;  %v239_v56 = vld [vmem:[#allocation2 + $0x101] sm:$0x1]  ;;  %v273_v62 = vld [vmem:[#allocation2 + $0x14e] sm:$0x1] }
  0x23   :  { %s865_s22 = sld [smem:[#allocation7 + $0x2]]  ;;  %v231_v35 = vmul.f32 %v230_v26, %v229_v22  ;;  %v235_v45 = vstv %s853_s16  ;;  %v263_v51 = vmul.f32 %v262_v37, %v230_v26  ;;  %v131_v5 = vld [vmem:[#allocation2 + $0xcc] sm:$0x1]  ;;  %v110_v10 = vld [vmem:[#allocation2 + $0x100] sm:$0x1] }
  0x24   :  { %v245_v11 = vstv %s618_s17  ;;  %s867_s23 = sld [smem:[#allocation7 + $0x4]]  ;;  %v222_v17 = vadd.f32 %v221_v7, %v217_v6  ;;  %v236_v49 = vmul.f32 %v235_v45, %v234_v36  ;;  %v271_v2 = vmul.f32 %v270_v52, %v235_v45  ;;  %v337_v7 = vld [vmem:[#allocation2] sm:$0x1]  ;;  %v135_v13 = vld [vmem:[#allocation2 + $0xcd] sm:$0x1] }
  0x25   :  { %s870_s24 = sld [smem:[#allocation7 + $0x11]]  ;;  %v246_v14 = vmul.f32 %v245_v11, %v244_v8  ;;  %v256_v20 = vstv %s855_s18  ;;  %v342_v22 = vld [vmem:[#allocation2 + $0x1] sm:$0x1]  ;;  %v347_v45 = vld [vmem:[#allocation2 + $0x80] sm:$0x1] }
  0x26   :  { %s873_s25 = sld [smem:[#allocation7 + $0x5]]  ;;  %v257_v30 = vmul.f32 %v256_v20, %v255_v19  ;;  %v227_v34 = vadd.f32 %v226_v18, %v222_v17  ;;  %v267_v42 = vstv %s857_s19 }
  0x27   :  { %v247_v23 = vadd.f32 %v246_v14, %v212_v4  ;;  %s875_s26 = sld [smem:[#allocation7 + $0x7]]  ;;  %v86_v38 = vstv %s861_s20  ;;  %v268_v58 = vmul.f32 %v267_v42, %v266_v41 }
  0x28   :  { %v89_v28 = vstv %s863_s21  ;;  %s879_s27 = sld [smem:[#allocation7]]  ;;  %v232_v55 = vadd.f32 %v231_v35, %v227_v34 }
  0x29   :  { %v250_v29 = vadd.f32 %v249_v15, %v247_v23  ;;  %v90_v31 = vmul.f32 %v89_v28, %v88_v21  ;;  %v94_v32 = vstv %s865_s22  ;;  %s882_s28 = sld [smem:[#allocation7 + $0x3]]  ;;  %v125_v1 = vmul.f32 %v124_v48, %v89_v28 }
  0x2a   :  { %v95_v39 = vmul.f32 %v94_v32, %v93_v25  ;;  %s885_s29 = sld [smem:[#allocation7 + $0x6]]  ;;  %v100_v44 = vstv %s867_s23  ;;  %v128_v12 = vmul.f32 %v127_v60, %v94_v32  ;;  %v237_v14 = vadd.f32 %v236_v49, %v232_v55  ;;  %v115_v25 = vld [vmem:[#allocation2 + $0x101] sm:$0x1] }
  0x2b   :  { %v253_v40 = vadd.f32 %v252_v24, %v250_v29  ;;  %v91_v43 = vadd.f32 %v90_v31, %v86_v38  ;;  %s889_s30 = sld [smem:[#allocation8 + $0x2]]  ;;  %v101_v46 = vmul.f32 %v100_v44, %v99_v33  ;;  %v240_v57 = vstv %s870_s24  ;;  %v142_v31 = vld [vmem:[#allocation2 + $0x14c] sm:$0x1] }
  0x2c   :  { %s892_s6 = sld [smem:[#allocation7 + $0x13]]  ;;  %v105_v63 = vstv %s873_s25  ;;  %v241_v8 = vmul.f32 %v240_v57, %v239_v56  ;;  %v274_v15 = vmul.f32 %v273_v62, %v240_v57  ;;  %v136_v26 = vmul.f32 %v135_v13, %v100_v44  ;;  %v146_v44 = vld [vmem:[#allocation2 + $0x14d] sm:$0x1] }
  0x2d   :  { %v258_v50 = vadd.f32 %v257_v30, %v253_v40  ;;  %v96_v53 = vadd.f32 %v95_v39, %v91_v43  ;;  %s894_s3 = sld [smem:[#allocation7 + $0x14]]  ;;  %v106_v4 = vmul.f32 %v105_v63, %v104_v54  ;;  %v111_v16 = vstv %s875_s26  ;;  %v371_v39 = vld [vmem:[#allocation2 + $0x4d] sm:$0x1] }
  0x2e   :  { %s897_s7 = sld [smem:[#allocation7 + $0x8]]  ;;  %v121_v59 = vstv %s879_s27  ;;  %v112_v24 = vmul.f32 %v111_v16, %v110_v10  ;;  %v242_v34 = vadd.f32 %v241_v8, %v237_v14  ;;  %v147_v56 = vmul.f32 %v146_v44, %v111_v16  ;;  %v497_v44 = vld [vmem:[#allocation2 + $0x4e] sm:$0x1] }
  0x2f   :  { %v261_v61 = vadd.f32 %v260_v27, %v258_v50  ;;  %v122_v0 = vmul.f32 %v121_v59, %v120_v47  ;;  %v102_v3 = vadd.f32 %v101_v46, %v96_v53  ;;  %v132_v6 = vstv %s882_s28  ;;  %s902_s8 = sld [smem:[#allocation7 + $0x16]]  ;;  %v138_v27 = vld [vmem:[#allocation2 + $0xce] sm:$0x1]  ;;  %v378_v59 = vld [vmem:[#allocation2 + $0xcc] sm:$0x1] }
  0x30   :  { %s904_s9 = sld [smem:[#allocation7 + $0x17]]  ;;  %v133_v20 = vmul.f32 %v132_v6, %v131_v5  ;;  %v143_v28 = vstv %s885_s29  ;;  %v139_v43 = vmul.f32 %v138_v27, %v105_v63  ;;  %v374_v50 = vld [vmem:[#allocation2 + $0x4e] sm:$0x1]  ;;  %v352_v63 = vld [vmem:[#allocation2 + $0x81] sm:$0x1] }
  0x31   :  { %v264_v9 = vadd.f32 %v263_v51, %v261_v61  ;;  %v123_v11 = vadd.f32 %v122_v0, %v86_v38  ;;  %s908_s0 = sld [smem:[#allocation7 + $0x12]]  ;;  %v107_v23 = vadd.f32 %v106_v4, %v102_v3  ;;  %v335_v32 = vstv %s889_s30  ;;  %v367_v38 = vld [vmem:[#allocation2 + $0x4c] sm:$0x1]  ;;  %v149_v53 = vld [vmem:[#allocation2 + $0x14e] sm:$0x1] }
  0x32   :  { %v338_v17 = vstv %s892_s6  ;;  %s910_s10 = sld [smem:[#allocation7 + $0x15]]  ;;  %v144_v47 = vmul.f32 %v143_v28, %v142_v31 }
  0x33   :  { %v269_v18 = vadd.f32 %v268_v58, %v264_v9  ;;  %v126_v19 = vadd.f32 %v125_v1, %v123_v11  ;;  %v339_v21 = vmul.f32 %v338_v17, %v337_v7  ;;  %s913_s11 = sld [smem:[#allocation7 + $0x19]]  ;;  %v343_v33 = vstv %s894_s3  ;;  %v460_v7 = vld [vmem:[#allocation2] sm:$0x1] }
  0x34   :  { %s917_s12 = sld [smem:[#allocation7 + $0x18]]  ;;  %v116_v35 = vstv %s897_s7  ;;  %v344_v37 = vmul.f32 %v343_v33, %v342_v22  ;;  %v113_v46 = vadd.f32 %v112_v24, %v107_v23  ;;  %v372_v55 = vmul.f32 %v371_v39, %v338_v17  ;;  %v465_v17 = vld [vmem:[#allocation2 + $0x1] sm:$0x1]  ;;  %v389_v24 = vld [vmem:[#allocation2 + $0x14c] sm:$0x1] }
  0x35   :  { %v272_v29 = vadd.f32 %v271_v2, %v269_v18  ;;  %v129_v30 = vadd.f32 %v128_v12, %v126_v19  ;;  %v340_v36 = vadd.f32 %v339_v21, %v335_v32  ;;  %s920_s13 = sld [smem:[#allocation7 + $0x1c]]  ;;  %v117_v41 = vmul.f32 %v116_v35, %v115_v25  ;;  %v382_v2 = vld [vmem:[#allocation2 + $0xcd] sm:$0x1]  ;;  %v385_v12 = vld [vmem:[#allocation2 + $0xce] sm:$0x1] }
  0x36   :  { %s922_s1 = sld [smem:[#allocation8 + $0x3]]  ;;  %v348_v48 = vstv %s902_s8  ;;  %v375_v1 = vmul.f32 %v374_v50, %v343_v33  ;;  %v150_v5 = vmul.f32 %v149_v53, %v116_v35  ;;  %v353_v6 = vstv %s904_s9  ;;  %v357_v19 = vld [vmem:[#allocation2 + $0x100] sm:$0x1]  ;;  %v490_v33 = vld [vmem:[#allocation2 + $0x4c] sm:$0x1] }
  0x37   :  { %v275_v40 = vadd.f32 %v274_v15, %v272_v29  ;;  %v134_v42 = vadd.f32 %v133_v20, %v129_v30  ;;  %v368_v49 = vstv %s908_s0  ;;  %s926_s2 = sld [smem:[#allocation7 + $0x1d]]  ;;  %v345_v57 = vadd.f32 %v344_v37, %v340_v36 }
  0x38   :  { %v369_v54 = vmul.f32 %v368_v49, %v367_v38  ;;  %v349_v58 = vmul.f32 %v348_v48, %v347_v45  ;;  %s928_s14 = sld [smem:[#allocation7 + $0x1a]]  ;;  %v379_v60 = vstv %s910_s10  ;;  %v118_v4 = vadd.f32 %v117_v41, %v113_v46  ;;  %v470_v38 = vld [vmem:[#allocation2 + $0x80] sm:$0x1]  ;;  %v362_v45 = vld [vmem:[#allocation2 + $0x101] sm:$0x1]  ;;  %s797_s10 = smov [#allocation12]  }
  0x39   :  { %v277_v51 = vrot.slane %v275_v40, 7  ;;  %v137_v52 = vadd.f32 %v136_v26, %v134_v42  ;;  %s934_s4 = sld [smem:[#allocation7 + $0x1f]]  ;;  %v358_v9 = vstv %s913_s11  ;;  %v380_v11 = vmul.f32 %v379_v60, %v378_v59  ;;  %v393_v26 = vld [vmem:[#allocation2 + $0x14d] sm:$0x1]  ;;  %s584_s11 = sshll.u32 %s797_s10, 4  ;;  %s585_s11 = int_to_ptr.vmem [resolvable:$true] %s584_s11 }
  0x3a   :  { %v370_v0 = vadd.f32 %v369_v54, %v335_v32  ;;  %s939_s15 = sld [smem:[#allocation7 + $0x1b]]  ;;  %v350_v13 = vadd.f32 %v349_v58, %v345_v57  ;;  %v354_v14 = vmul.f32 %v353_v6, %v352_v63  ;;  %v383_v21 = vmul.f32 %v382_v2, %v348_v48  ;;  %v505_v2 = vld [vmem:[#allocation2 + $0xcd] sm:$0x1] }
  0x3b   :  { %v932_v61 = vsel %vm155_vm0, %v242_v34, %v277_v51  ;;  %v140_v62 = vadd.f32 %v139_v43, %v137_v52  ;;  %v461_v16 = vstv %s920_s13  ;;  %s945_s16 = sld [smem:[#allocation7 + $0x1e]]  ;;  %v386_v23 = vmul.f32 %v385_v12, %v353_v6  ;;  %v494_v34 = vld [vmem:[#allocation2 + $0x4d] sm:$0x1] }
  0x3c   :  { %v280_v3 = vsel %vm157_vm1, %v932_v61, 0.0  ;;  %v373_v10 = vadd.f32 %v372_v55, %v370_v0  ;;  %v291_v15 = vmul.f32 %v932_v61, %v932_v61  ;;  %v462_v22 = vmul.f32 %v461_v16, %v460_v7  ;;  %s950_s17 = sld [smem:[#allocation7 + $0x20]]  ;;  %v501_v55 = vld [vmem:[#allocation2 + $0xcc] sm:$0x1] }
  0x3d   :  { %281 = vadd.xlane.f32.xlu1 %v280_v3  ;;  %v145_v8 = vadd.f32 %v144_v47, %v140_v62  ;;  %v390_v25 = vstv %s917_s12  ;;  %v458_v27 = vstv %s922_s1  ;;  %v466_v28 = vstv %s926_s2  ;;  %s955_s18 = sld [smem:[#allocation7 + $0x21]]  ;;  %v396_v47 = vld [vmem:[#allocation2 + $0x14e] sm:$0x1]  ;;  %s586_s1 = sshll.u32 %s1044_s5, 4  ;;  %s587_s1 = int_to_ptr.hbm [resolvable:$true] %s586_s1 }
  0x3e   :  { %v376_v20 = vadd.f32 %v375_v1, %v373_v10  ;;  %v463_v31 = vadd.f32 %v462_v22, %v458_v27  ;;  %v467_v32 = vmul.f32 %v466_v28, %v465_v17  ;;  %v359_v35 = vmul.f32 %v358_v9, %v357_v19  ;;  %s961_s19 = sld [smem:[#allocation7 + $0x22]]  ;;  %v475_v1 = vld [vmem:[#allocation2 + $0x81] sm:$0x1]  ;;  %s798_s2 = smov 32  }
  0x3f   :  { %v148_v18 = vadd.f32 %v147_v56, %v145_v8  ;;  %v363_v36 = vstv %s928_s14  ;;  %v292_v37 = vsel %vm157_vm1, %v291_v15, 0.0  ;;  %v355_v41 = vadd.f32 %v354_v14, %v350_v13  ;;  %s966_s20 = sld [smem:[#allocation7 + $0x23]]  ;;  %v508_v8 = vld [vmem:[#allocation2 + $0xce] sm:$0x1]  ;;  %v480_v15 = vld [vmem:[#allocation2 + $0x100] sm:$0x1] }
  0x40   :  { %v381_v30 = vadd.f32 %v380_v11, %v376_v20  ;;  %v491_v39 = vstv %s939_s15  ;;  %v391_v43 = vmul.f32 %v390_v25, %v389_v24  ;;  %v394_v46 = vmul.f32 %v393_v26, %v358_v9  ;;  %v485_v26 = vld [vmem:[#allocation2 + $0x101] sm:$0x1]  ;;  %s1003_s28 = sld [smem:[#allocation9]]  ;;  %s799_s14 = smov 2  }
  0x41   :  { %v151_v29 = vadd.f32 %v150_v5, %v148_v18  ;;  %v471_v48 = vstv %s934_s4  ;;  %v492_v49 = vmul.f32 %v491_v39, %v490_v33  ;;  %v495_v50 = vmul.f32 %v494_v34, %v461_v16  ;;  %v512_v16 = vld [vmem:[#allocation2 + $0x14c] sm:$0x1]  ;;  %s1009_s30 = sld [smem:[#allocation9 + $0x1]] }
  0x42   :  { %v384_v42 = vadd.f32 %v383_v21, %v381_v30  ;;  %v468_v53 = vadd.f32 %v467_v32, %v463_v31  ;;  %v472_v54 = vmul.f32 %v471_v48, %v470_v38  ;;  %v498_v58 = vmul.f32 %v497_v44, %v466_v28  ;;  %v519_v31 = vld [vmem:[#allocation2 + $0x14e] sm:$0x1]  ;;  %s1011_s6 = sld [smem:[#allocation11]] }
  0x43   :  { %v153_v40 = vrot.slane %v151_v29, 7  ;;  %v493_v57 = vadd.f32 %v492_v49, %v458_v27  ;;  %v502_v59 = vstv %s945_s16  ;;  %v360_v60 = vadd.f32 %v359_v35, %v355_v41  ;;  %s1013_s3 = sld [smem:[#allocation11 + $0x1]] }
  0x44   :  { %v387_v52 = vadd.f32 %v386_v23, %v384_v42  ;;  %v364_v62 = vmul.f32 %v363_v36, %v362_v45  ;;  %v397_v0 = vmul.f32 %v396_v47, %v363_v36  ;;  %v503_v5 = vmul.f32 %v502_v59, %v501_v55  ;;  %v516_v23 = vld [vmem:[#allocation2 + $0x14d] sm:$0x1]  ;;  %s1016_s7 = sld [smem:[#allocation9 + $0x2]] }
  0x45   :  { %v959_v51 = vsel %vm155_vm0, %v118_v4, %v153_v40  ;;  %293 = vadd.xlane.f32.xlu1 %v292_v37  ;;  %v496_v4 = vadd.f32 %v495_v50, %v493_v57  ;;  %v476_v7 = vstv %s950_s17  ;;  %v473_v9 = vadd.f32 %v472_v54, %v468_v53  ;;  %s1021_s8 = sld [smem:[#allocation11 + $0x2]] }
  0x46   :  { %v158_v56 = vsel %vm157_vm1, %v959_v51, 0.0  ;;  %v392_v63 = vadd.f32 %v391_v43, %v387_v52  ;;  %v169_v3 = vmul.f32 %v959_v51, %v959_v51  ;;  %v477_v10 = vmul.f32 %v476_v7, %v475_v1  ;;  %s1023_s9 = sld [smem:[#allocation9 + $0x3]] }
  0x47   :  { %159 = vadd.xlane.f32.xlu0 %v158_v56  ;;  %v499_v11 = vadd.f32 %v498_v58, %v496_v4  ;;  %v506_v12 = vmul.f32 %v505_v2, %v471_v48  ;;  %v365_v13 = vadd.f32 %v364_v62, %v360_v60  ;;  %v513_v17 = vstv %s955_s18  ;;  %s648_s0 = sld [smem:[#allocation11 + $0x3]] }
  0x48   :  { %v395_v6 = vadd.f32 %v394_v46, %v392_v63  ;;  %v170_v18 = vsel %vm157_vm1, %v169_v3, 0.0  ;;  %v509_v20 = vmul.f32 %v508_v8, %v476_v7  ;;  %v481_v22 = vstv %s961_s19 }
  0x49   :  { %v504_v19 = vadd.f32 %v503_v5, %v499_v11  ;;  %v478_v24 = vadd.f32 %v477_v10, %v473_v9  ;;  %v482_v25 = vmul.f32 %v481_v22, %v480_v15  ;;  %v514_v28 = vmul.f32 %v513_v17, %v512_v16 }
  0x4a   :  { %v398_v14 = vadd.f32 %v397_v0, %v395_v6  ;;  %v486_v30 = vstv %s966_s20  ;;  %v517_v34 = vmul.f32 %v516_v23, %v481_v22 }
  0x4b   :  { %v507_v27 = vadd.f32 %v506_v12, %v504_v19  ;;  %v487_v35 = vmul.f32 %v486_v30, %v485_v26  ;;  %v483_v37 = vadd.f32 %v482_v25, %v478_v24  ;;  %v520_v39 = vmul.f32 %v519_v31, %v486_v30 }
  0x4c   :  { %v400_v21 = vrot.slane %v398_v14, 7 }
  0x4d   :  { %v510_v33 = vadd.f32 %v509_v20, %v507_v27  ;;  %v488_v42 = vadd.f32 %v487_v35, %v483_v37 }
  0x4e   :  { %v975_v29 = vsel %vm155_vm0, %v365_v13, %v400_v21 }
  0x4f   :  { %171 = vadd.xlane.f32.xlu0 %v170_v18  ;;  %v403_v32 = vsel %vm157_vm1, %v975_v29, 0.0  ;;  %v414_v36 = vmul.f32 %v975_v29, %v975_v29  ;;  %v515_v38 = vadd.f32 %v514_v28, %v510_v33 }
  0x50   :  { %404 = vadd.xlane.f32.xlu2 %v403_v32 }
  0x51   :  { %v518_v40 = vadd.f32 %v517_v34, %v515_v38  ;;  %v415_v41 = vsel %vm157_vm1, %v414_v36, 0.0 }
  0x53   :  { %v521_v43 = vadd.f32 %v520_v39, %v518_v40 }
  0x55   :  { %v523_v44 = vrot.slane %v521_v43, 7 }
  0x57   :  { %v984_v45 = vsel %vm155_vm0, %v488_v42, %v523_v44 }
  0x58   :  { %416 = vadd.xlane.f32.xlu2 %v415_v41  ;;  %v537_v46 = vmul.f32 %v984_v45, %v984_v45  ;;  %v526_v47 = vsel %vm157_vm1, %v984_v45, 0.0 }
  0x59   :  { %527 = vadd.xlane.f32.xlu0 %v526_v47 }
  0x5a   :  { %v538_v48 = vsel %vm157_vm1, %v537_v46, 0.0 }
  0x5b   :  { %539 = vadd.xlane.f32.xlu1 %v538_v48 }
  0xb0   :  { %v282_v49 = vpop.xlane.xlu1 %281 }
  0xb1   :  { %v283_v53 = vrot.slane %v282_v49, 4 }
  0xb3   :  { %v284_v58 = vadd.f32 %v283_v53, %v282_v49 }
  0xb5   :  { %v285_v63 = vrot.slane %v284_v58, 2 }
  0xb7   :  { %v286_v8 = vadd.f32 %v285_v63, %v284_v58 }
  0xb8   :  { %v294_v50 = vpop.xlane.xlu1 %293 }
  0xb9   :  { %v295_v52 = vrot.slane %v294_v50, 4  ;;  %v287_v14 = vrot.slane %v286_v8, 1 }
  0xba   :  { %v160_v54 = vpop.xlane.xlu0 %159 }
  0xbb   :  { %v161_v55 = vrot.slane %v160_v54, 4  ;;  %v296_v57 = vadd.f32 %v295_v52, %v294_v50  ;;  %v288_v22 = vadd.f32 %v287_v14, %v286_v8 }
  0xbd   :  { %v162_v56 = vadd.f32 %v161_v55, %v160_v54  ;;  %v297_v60 = vrot.slane %v296_v57, 2 }
  0xbf   :  { %v163_v59 = vrot.slane %v162_v56, 2  ;;  %v298_v7 = vadd.f32 %v297_v60, %v296_v57 }
  0xc1   :  { %v164_v62 = vadd.f32 %v163_v59, %v162_v56  ;;  %v299_v13 = vrot.slane %v298_v7, 1 }
  0xc2   :  { %v172_v0 = vpop.xlane.xlu0 %171 }
  0xc3   :  { %v173_v1 = vrot.slane %v172_v0, 4  ;;  %v165_v2 = vrot.slane %v164_v62, 1  ;;  %v405_v3 = vpop.xlane.xlu2 %404  ;;  %v300_v20 = vadd.f32 %v299_v13, %v298_v7 }
  0xc4   :  { %v406_v4 = vrot.slane %v405_v3, 4 }
  0xc5   :  { %v174_v5 = vadd.f32 %v173_v1, %v172_v0  ;;  %v166_v6 = vadd.f32 %v165_v2, %v164_v62 }
  0xc6   :  { %v407_v9 = vadd.f32 %v406_v4, %v405_v3 }
  0xc7   :  { %v175_v10 = vrot.slane %v174_v5, 2  ;;  %650 = vpush %v166_v6 }
  0xc8   :  { %v408_v11 = vrot.slane %v407_v9, 2 }
  0xc9   :  { %v176_v12 = vadd.f32 %v175_v10, %v174_v5 }
  0xca   :  { %v409_v16 = vadd.f32 %v408_v11, %v407_v9 }
  0xcb   :  { %v177_v15 = vrot.slane %v176_v12, 1  ;;  %v417_v17 = vpop.xlane.xlu2 %416 }
  0xcc   :  { %v418_v18 = vrot.slane %v417_v17, 4  ;;  %v410_v21 = vrot.slane %v409_v16, 1  ;;  %v528_v24 = vpop.xlane.xlu0 %527 }
  0xcd   :  { %v178_v19 = vadd.f32 %v177_v15, %v176_v12  ;;  %v529_v25 = vrot.slane %v528_v24, 4 }
  0xce   :  { %v419_v23 = vadd.f32 %v418_v18, %v417_v17  ;;  %v411_v26 = vadd.f32 %v410_v21, %v409_v16  ;;  %v540_v28 = vpop.xlane.xlu1 %539  ;;  %v197_v21 = vstv %s1003_s28 }
  0xcf   :  { %652 = vpush %v178_v19  ;;  %v541_v30 = vrot.slane %v540_v28, 4  ;;  %v530_v31 = vadd.f32 %v529_v25, %v528_v24 }
  0xd0   :  { %654 = vpush %v288_v22  ;;  %v420_v27 = vrot.slane %v419_v23, 2 }
  0xd1   :  { %656 = vpush %v300_v20  ;;  %v542_v33 = vadd.f32 %v541_v30, %v540_v28  ;;  %v531_v34 = vrot.slane %v530_v31, 2  ;;  %v319_v28 = vstv %s1009_s30  ;;  %v201_v30 = vstv %s1011_s6 }
  0xd2   :  { %658 = vpush %v411_v26  ;;  %v421_v32 = vadd.f32 %v420_v27, %v419_v23 }
  0xd3   :  { %v543_v36 = vrot.slane %v542_v33, 2  ;;  %v532_v37 = vadd.f32 %v531_v34, %v530_v31 }
  0xd4   :  { %v422_v35 = vrot.slane %v421_v32, 1 }
  0xd5   :  { %v544_v39 = vadd.f32 %v543_v36, %v542_v33  ;;  %v533_v40 = vrot.slane %v532_v37, 1 }
  0xd6   :  { %v423_v38 = vadd.f32 %v422_v35, %v421_v32 }
  0xd7   :  { %v534_v41 = vadd.f32 %v533_v40, %v532_v37  ;;  %v545_v42 = vrot.slane %v544_v39, 1 }
  0xd8   :  { %660 = vpush %v423_v38 }
  0xd9   :  { %662 = vpush %v534_v41  ;;  %v546_v43 = vadd.f32 %v545_v42, %v544_v39  ;;  %v323_v39 = vstv %s1013_s3 }
  0xdb   :  { %664 = vpush %v546_v43 }
  0xf8   :  { %s651_s21 = spop %650 }
  0xf9   :  { %v168_v44 = vstv %s651_s21 }
  0xfa   :  { %v991_v46 = vmul.f32 0.00390625, %v168_v44  ;;  %v442_v44 = vstv %s1016_s7 }
  0xfc   :  { %v183_v48 = vmul.f32 %v991_v46, %v991_v46 }
 0x100   :  { %s653_s22 = spop %652 }
 0x101   :  { %v180_v47 = vstv %s653_s22  ;;  %s655_s23 = spop %654 }
 0x102   :  { %v182_v49 = vmul.f32 0.00390625, %v180_v47  ;;  %v290_v50 = vstv %s655_s23  ;;  %s657_s24 = spop %656 }
 0x103   :  { %v995_v52 = vmul.f32 0.00390625, %v290_v50  ;;  %v302_v53 = vstv %s657_s24  ;;  %s659_s25 = spop %658 }
 0x104   :  { %v184_v54 = vsub.f32 %v182_v49, %v183_v48  ;;  %v413_v55 = vstv %s659_s25  ;;  %v304_v57 = vmul.f32 0.00390625, %v302_v53 }
 0x105   :  { %v305_v56 = vmul.f32 %v995_v52, %v995_v52  ;;  %v999_v59 = vmul.f32 0.00390625, %v413_v55 }
 0x106   :  { %v186_v58 = vadd.f32 1e-05, %v184_v54 }
 0x107   :  { %v306_v60 = vsub.f32 %v304_v57, %v305_v56  ;;  %v428_v63 = vmul.f32 %v999_v59, %v999_v59 }
 0x108   :  { %676 = vrsqrt.f32 %v186_v58  ;;  %vm193_vm3 = vweird.f32 %v186_v58 }
 0x109   :  { %v308_v62 = vadd.f32 1e-05, %v306_v60  ;;  %s661_s26 = spop %660  ;;  %v565_v60 = vstv %s1023_s9 }
 0x10a   :  { %v425_v0 = vstv %s661_s26  ;;  %s663_s27 = spop %662 }
 0x10b   :  { %678 = vrsqrt.f32 %v308_v62  ;;  %v427_v1 = vmul.f32 0.00390625, %v425_v0  ;;  %v536_v4 = vstv %s663_s27  ;;  %vm315_vm6 = vweird.f32 %v308_v62 }
 0x10c   :  { %v1005_v6 = vmul.f32 0.00390625, %v536_v4  ;;  %s665_s29 = spop %664 }
 0x10d   :  { %v429_v3 = vsub.f32 %v427_v1, %v428_v63  ;;  %v548_v8 = vstv %s665_s29 }
 0x10e   :  { %v677_v2 = vpop.eup %676  ;;  %v551_v11 = vmul.f32 %v1005_v6, %v1005_v6  ;;  %v550_v12 = vmul.f32 0.00390625, %v548_v8 }
 0x10f   :  { %v188_v5 = vmul.f32 %v677_v2, %v186_v58  ;;  %v431_v7 = vadd.f32 1e-05, %v429_v3  ;;  %vm194_vm2 = vweird.f32 %v677_v2  ;;  %v446_v58 = vstv %s1021_s8 }
 0x110   :  { %v552_v15 = vsub.f32 %v550_v12, %v551_v11  ;;  %vm195_vm4 = vmor %vm193_vm3, %vm194_vm2 }
 0x111   :  { %v679_v9 = vpop.eup %678  ;;  %v189_v10 = vmul.f32 %v677_v2, %v188_v5  ;;  %680 = vrsqrt.f32 %v431_v7  ;;  %vm438_vm9 = vweird.f32 %v431_v7 }
 0x112   :  { %v310_v13 = vmul.f32 %v679_v9, %v308_v62  ;;  %v554_v18 = vadd.f32 1e-05, %v552_v15  ;;  %vm316_vm5 = vweird.f32 %v679_v9 }
 0x113   :  { %v190_v14 = vmul.f32 0.5, %v189_v10  ;;  %vm317_vm7 = vmor %vm315_vm6, %vm316_vm5 }
 0x114   :  { %v311_v16 = vmul.f32 %v679_v9, %v310_v13  ;;  %682 = vrsqrt.f32 %v554_v18  ;;  %vm561_vm12 = vweird.f32 %v554_v18 }
 0x115   :  { %v191_v17 = vsub.f32 1.5, %v190_v14 }
 0x116   :  { %v312_v19 = vmul.f32 0.5, %v311_v16 }
 0x117   :  { %v192_v20 = vmul.f32 %v677_v2, %v191_v17  ;;  %v681_v22 = vpop.eup %680 }
 0x118   :  { %v313_v23 = vsub.f32 1.5, %v312_v19  ;;  %v433_v25 = vmul.f32 %v681_v22, %v431_v7  ;;  %vm439_vm8 = vweird.f32 %v681_v22 }
 0x119   :  { %v196_v24 = vsel %vm195_vm4, %v677_v2, %v192_v20  ;;  %vm440_vm10 = vmor %vm438_vm9, %vm439_vm8 }
 0x11a   :  { %v198_v26 = vmul.f32 %v197_v21, %v196_v24  ;;  %v314_v27 = vmul.f32 %v679_v9, %v313_v23  ;;  %v434_v31 = vmul.f32 %v681_v22, %v433_v25  ;;  %v683_v34 = vpop.eup %682 }
 0x11b   :  { %v556_v40 = vmul.f32 %v683_v34, %v554_v18  ;;  %vm562_vm11 = vweird.f32 %v683_v34 }
 0x11c   :  { %v200_v32 = vmul.f32 %v198_v26, %v991_v46  ;;  %v318_v33 = vsel %vm317_vm7, %v679_v9, %v314_v27  ;;  %v435_v36 = vmul.f32 0.5, %v434_v31  ;;  %v203_v38 = vmul.f32 %v198_v26, %v959_v51  ;;  %vm563_vm13 = vmor %vm561_vm12, %vm562_vm11 }
 0x11d   :  { %v320_v35 = vmul.f32 %v319_v28, %v318_v33  ;;  %v557_v46 = vmul.f32 %v683_v34, %v556_v40  ;;  %v569_v9 = vstv %s648_s0 }
 0x11e   :  { %v202_v37 = vsub.f32 %v201_v30, %v200_v32  ;;  %v436_v42 = vsub.f32 1.5, %v435_v36 }
 0x11f   :  { %v322_v41 = vmul.f32 %v320_v35, %v995_v52  ;;  %v325_v48 = vmul.f32 %v320_v35, %v932_v61  ;;  %v558_v53 = vmul.f32 0.5, %v557_v46 }
 0x120   :  { %v204_v43 = vadd.f32 %v203_v38, %v202_v37  ;;  %v437_v49 = vmul.f32 %v681_v22, %v436_v42 }
 0x121   :  { %v324_v47 = vsub.f32 %v323_v39, %v322_v41  ;;  %v559_v56 = vsub.f32 1.5, %v558_v53 }
 0x122   :  { %v205_v50 = vadd.f32 3.0, %v204_v43  ;;  %v441_v54 = vsel %vm440_vm10, %v681_v22, %v437_v49 }
 0x123   :  { %v326_v51 = vadd.f32 %v325_v48, %v324_v47  ;;  %v443_v52 = vmul.f32 %v442_v44, %v441_v54  ;;  %v560_v63 = vmul.f32 %v683_v34, %v559_v56 }
 0x124   :  { %v206_v55 = vmax.f32 %v205_v50, 0.0 }
 0x125   :  { %v327_v57 = vadd.f32 3.0, %v326_v51  ;;  %v445_v62 = vmul.f32 %v443_v52, %v999_v59  ;;  %v448_v2 = vmul.f32 %v443_v52, %v975_v29  ;;  %v564_v3 = vsel %vm563_vm13, %v683_v34, %v560_v63 }
 0x126   :  { %v207_v61 = vmin.f32 %v206_v55, 6.0  ;;  %v566_v5 = vmul.f32 %v565_v60, %v564_v3 }
 0x127   :  { %v328_v0 = vmax.f32 %v327_v57, 0.0  ;;  %v447_v1 = vsub.f32 %v446_v58, %v445_v62 }
 0x128   :  { %v610_v4 = vadd.f32 -3.0, %v207_v61  ;;  %v568_v11 = vmul.f32 %v566_v5, %v1005_v6  ;;  %v571_v14 = vmul.f32 %v566_v5, %v984_v45 }
 0x129   :  { %v329_v7 = vmin.f32 %v328_v0, 6.0  ;;  %v449_v8 = vadd.f32 %v448_v2, %v447_v1 }
 0x12a   :  { %v209_v10 = vmul.f32 0.33333334, %v610_v4  ;;  %v570_v59 = vsub.f32 %v569_v9, %v568_v11 }
 0x12b   :  { %v623_v12 = vadd.f32 -3.0, %v329_v7  ;;  %v450_v13 = vadd.f32 3.0, %v449_v8 }
 0x12c   :  { %210 = vst [vmem:[#allocation12] sm:$0x3] %v209_v10  ;;  %v572_v17 = vadd.f32 %v571_v14, %v570_v59 }
 0x12d   :  { %v331_v15 = vmul.f32 0.33333334, %v623_v12  ;;  %v451_v16 = vmax.f32 %v450_v13, 0.0 }
 0x12e   :  { %v573_v18 = vadd.f32 3.0, %v572_v17 }
 0x12f   :  { %333 = vst [vmem:[#allocation12 + $0x2] sm:$0x3] %v331_v15  ;;  %v452_v29 = vmin.f32 %v451_v16, 6.0 }
 0x130   :  { %v574_v20 = vmax.f32 %v573_v18, 0.0 }
 0x131   :  { %v636_v19 = vadd.f32 -3.0, %v452_v29 }
 0x132   :  { %v575_v22 = vmin.f32 %v574_v20, 6.0 }
 0x133   :  { %v454_v21 = vmul.f32 0.33333334, %v636_v19 }
 0x134   :  { %v649_v6 = vadd.f32 -3.0, %v575_v22 }
 0x135   :  { %456 = vst [vmem:[#allocation12 + $0x4] sm:$0x3] %v454_v21 }
 0x136   :  { %v577_v45 = vmul.f32 0.33333334, %v649_v6 }
 0x138   :  { %579 = vst [vmem:[#allocation12 + $0x6] sm:$0x3] %v577_v45 }
 0x139   :  { %592 = dma.vmem_to_hbm [thread:$0]  %s585_s11, 128, %s587_s1, [#allocation4], %s798_s2, %s798_s2, %s799_s14  }
 0x13a   :  { %788 = dma.done.wait [#allocation4], 128  }
 0x13b   :  { %789 = vsyncadd [#allocation4], 4294967168 }
 0x13c   :  { %597 = vsyncpa [#allocation3], 1 }
 0x13d   :  { %598 = vsyncpa [#allocation4], 1 }
 0x13e   :  { %599 = vsyncpa [#allocation5], 1 }
 0x13f   :  { %600 = vsyncpa [#allocation6], 1 }
 0x140   :  { %601 = vsyncpa [#allocation10], 1 }

</bundles_post_ra>
